<compile_context>
chip_gen: v6e
topology: v6e:2x2x1
jax: 0.10.0
libtpu: 0.0.40
codegen_flags: <defaults>
</compile_context>

<pallas_src>
import jax
import jax.numpy as jnp
from jax import lax
from jax.experimental import pallas as pl
from jax.experimental.pallas import tpu as pltpu

# ----------------------------- tiny BERT config ------------------------------
VOCAB = 64
TYPE_VOCAB = 2
MAX_POS = 32
SEQ = 8
HIDDEN = 32
NUM_HEADS = 2
HEAD_DIM = HIDDEN // NUM_HEADS
INTER = 64
NUM_LAYERS = 2
NUM_WHERE_CONDITIONS = 4          # num_labels
LN_EPS = 1e-12
ATTN_SCALE = HEAD_DIM ** -0.5

# packed-blob lane offsets inside w32_blob
_QKV_OFF = 0                      # lanes [0, 3H)
_WO_OFF = 3 * HIDDEN              # lanes [3H, 4H)
_WI_OFF = 4 * HIDDEN              # lanes [4H, 4H+I)
_W32_LANES = 4 * HIDDEN + INTER   # 192


def _layer_norm(x, g, b):
    mu = jnp.mean(x, axis=-1, keepdims=True)
    var = jnp.mean((x - mu) ** 2, axis=-1, keepdims=True)
    return (x - mu) * lax.rsqrt(var + LN_EPS) * g + b


# ----------------------------- fused forward kernel ---------------------------
def bert_forward_kernel(tok_ref, emb_ref, w32_ref, w64_ref, vec_ref, logits_ref):
    f32 = jnp.float32
    bf16 = jnp.bfloat16

    # ---- unpack the single token blob (one DMA) ----
    ids = tok_ref[0:SEQ, 0:1]                                   # [S, 1] int32
    tt = tok_ref[0:SEQ, 1:2].astype(f32)                        # [S, 1] in {0, 1}
    mask_row = tok_ref[SEQ:SEQ + 1, 0:SEQ].astype(f32)          # [1, S]
    add_mask = (1.0 - mask_row) * -10000.0                      # classic BERT additive mask

    # ---- embeddings: word lookup as one-hot matmul (MXU), type as 2-row blend ----
    one_hot = (ids == lax.broadcasted_iota(jnp.int32, (SEQ, VOCAB), 1)).astype(bf16)
    word_sel = jnp.dot(one_hot, emb_ref[0:VOCAB, :].astype(bf16),
                       preferred_element_type=f32)              # [S, H]
    pos_sel = emb_ref[VOCAB:VOCAB + SEQ, :]                     # position_ids = arange(SEQ)
    te0 = emb_ref[VOCAB + MAX_POS:VOCAB + MAX_POS + 1, :]
    te1 = emb_ref[VOCAB + MAX_POS + 1:VOCAB + MAX_POS + 2, :]
    type_sel = (1.0 - tt) * te0 + tt * te1                      # [S, H]

    head_vec = vec_ref[NUM_LAYERS]                              # [8, 96] f32 (non-layer params)
    emb_g = head_vec[0:1, 0:HIDDEN]
    emb_b = head_vec[1:2, 0:HIDDEN]
    x = _layer_norm(word_sel + pos_sel + type_sel, emb_g, emb_b)

    # ---- encoder layers (static Python loop, weights sliced at static offsets) ----
    for l in range(NUM_LAYERS):
        wl = w32_ref[l]                                         # [32, 192] bf16
        vl = vec_ref[l]                                         # [8, 96]   f32
        bqkv = vl[0:1, 0:3 * HIDDEN]
        bo = vl[1:2, 0:HIDDEN]
        bi = vl[2:3, 0:INTER]
        bo2 = vl[3:4, 0:HIDDEN]
        ln1g = vl[4:5, 0:HIDDEN]
        ln1b = vl[5:6, 0:HIDDEN]
        ln2g = vl[6:7, 0:HIDDEN]
        ln2b = vl[7:8, 0:HIDDEN]

        # fused QKV projection: bf16 MXU inputs, f32 accumulate
        qkv = jnp.dot(x.astype(bf16), wl[:, _QKV_OFF:_QKV_OFF + 3 * HIDDEN],
                      preferred_element_type=f32) + bqkv        # [S, 3H]

        # per-head attention: plain 2-D dots contracting over HEAD_DIM (no stack/concat relayout)
        ctx_parts = []
        for h in range(NUM_HEADS):
            q = qkv[:, h * HEAD_DIM:(h + 1) * HEAD_DIM]
            k = qkv[:, HIDDEN + h * HEAD_DIM:HIDDEN + (h + 1) * HEAD_DIM]
            v = qkv[:, 2 * HIDDEN + h * HEAD_DIM:2 * HIDDEN + (h + 1) * HEAD_DIM]

            scores = lax.dot_general(q.astype(bf16), k.astype(bf16),
                                     (((1,), (1,)), ((), ())),
                                     preferred_element_type=f32) * ATTN_SCALE   # [S, S]
            scores = scores + add_mask
            m = jnp.max(scores, axis=-1, keepdims=True)
            p = jnp.exp(scores - m)
            p = p * pl.reciprocal(jnp.sum(p, axis=-1, keepdims=True), approx=True)
            ctx_parts.append(jnp.dot(p.astype(bf16), v.astype(bf16),
                                     preferred_element_type=f32))               # [S, HD]
        ctx = jnp.concatenate(ctx_parts, axis=-1)                               # [S, H]

        attn_out = jnp.dot(ctx.astype(bf16), wl[:, _WO_OFF:_WO_OFF + HIDDEN],
                           preferred_element_type=f32) + bo
        x1 = _layer_norm(attn_out + x, ln1g, ln1b)

        hi = jnp.dot(x1.astype(bf16), wl[:, _WI_OFF:_WI_OFF + INTER],
                     preferred_element_type=f32) + bi
        # TODO(synk): HF BERT uses exact (erf) GELU; tanh-approx GELU used here (EUP-friendly).
        hi = jax.nn.gelu(hi, approximate=True)
        ff = jnp.dot(hi.astype(bf16), w64_ref[l], preferred_element_type=f32) + bo2
        x = _layer_norm(ff + x1, ln2g, ln2b)

    # ---- pooler on [CLS] + classifier (dropout is identity in eval) ----
    head_w = w32_ref[NUM_LAYERS]                                # [32, 192] bf16
    pooler_w = head_w[:, 0:HIDDEN]
    cls_w = head_w[:, HIDDEN:HIDDEN + NUM_WHERE_CONDITIONS]
    pooler_b = head_vec[2:3, 0:HIDDEN]
    cls_b = head_vec[3:4, 0:NUM_WHERE_CONDITIONS]

    cls_tok = x[0:1, :]                                         # [1, H]
    pooled = jnp.tanh(jnp.dot(cls_tok.astype(bf16), pooler_w,
                              preferred_element_type=f32) + pooler_b)
    logits_ref[...] = jnp.dot(pooled.astype(bf16), cls_w,
                              preferred_element_type=f32) + cls_b


# ----------------------------- parameter init (pre-packed blobs) --------------
def init_params(key):
    std = 0.02
    ks = iter(jax.random.split(key, 24))

    def nrm(shape):
        return (std * jax.random.normal(next(ks), shape)).astype(jnp.float32)

    # embedding blob: word | pos | type stacked on rows
    emb_blob = jnp.concatenate([nrm((VOCAB, HIDDEN)),
                                nrm((MAX_POS, HIDDEN)),
                                nrm((TYPE_VOCAB, HIDDEN))], axis=0)            # [98, 32]

    w32_slabs, w64_slabs, vec_slabs = [], [], []
    for _ in range(NUM_LAYERS):
        wqkv = nrm((HIDDEN, 3 * HIDDEN))
        wo = nrm((HIDDEN, HIDDEN))
        wi = nrm((HIDDEN, INTER))
        wo2 = nrm((INTER, HIDDEN))
        w32_slabs.append(jnp.concatenate([wqkv, wo, wi], axis=1))             # [32, 192]
        w64_slabs.append(wo2)                                                  # [64, 32]

        vec = jnp.zeros((8, 3 * HIDDEN), jnp.float32)                          # [8, 96]
        vec = vec.at[0, 0:3 * HIDDEN].set(nrm((3 * HIDDEN,)))                  # bqkv
        vec = vec.at[1, 0:HIDDEN].set(nrm((HIDDEN,)))                          # bo
        vec = vec.at[2, 0:INTER].set(nrm((INTER,)))                            # bi
        vec = vec.at[3, 0:HIDDEN].set(nrm((HIDDEN,)))                          # bo2
        vec = vec.at[4, 0:HIDDEN].set(1.0)                                     # ln1 gamma
        vec = vec.at[6, 0:HIDDEN].set(1.0)                                     # ln2 gamma
        vec_slabs.append(vec)                                                  # betas stay 0

    # head slab: pooler_w (lanes 0:32) + classifier_w (lanes 32:36), rest zero
    head32 = jnp.zeros((HIDDEN, _W32_LANES), jnp.float32)
    head32 = head32.at[:, 0:HIDDEN].set(nrm((HIDDEN, HIDDEN)))
    head32 = head32.at[:, HIDDEN:HIDDEN + NUM_WHERE_CONDITIONS].set(
        nrm((HIDDEN, NUM_WHERE_CONDITIONS)))
    w32_slabs.append(head32)

    head_vec = jnp.zeros((8, 3 * HIDDEN), jnp.float32)
    head_vec = head_vec.at[0, 0:HIDDEN].set(1.0)                               # emb LN gamma
    head_vec = head_vec.at[2, 0:HIDDEN].set(nrm((HIDDEN,)))                    # pooler bias
    head_vec = head_vec.at[3, 0:NUM_WHERE_CONDITIONS].set(nrm((NUM_WHERE_CONDITIONS,)))
    vec_slabs.append(head_vec)

    return {
        "emb_blob": emb_blob,                                                  # f32
        "w32_blob": jnp.stack(w32_slabs, axis=0).astype(jnp.bfloat16),         # [L+1,32,192]
        "w64_blob": jnp.stack(w64_slabs, axis=0).astype(jnp.bfloat16),         # [L,64,32]
        "vec_blob": jnp.stack(vec_slabs, axis=0),                              # [L+1,8,96] f32
    }


# ----------------------------- forward (== module.forward) --------------------
@jax.jit
def where_condition_classifier_forward(params, input_ids, attention_mask, token_type_ids):
    # mirrors `.unsqueeze(0)` -> implicit batch of 1; returns logits [1, NUM_WHERE_CONDITIONS]
    cols = jnp.stack([input_ids.astype(jnp.int32),
                      token_type_ids.astype(jnp.int32)], axis=1)               # [S, 2]
    cols = jnp.pad(cols, ((0, 0), (0, SEQ - 2)))                               # [S, S]
    mask_row = attention_mask.astype(jnp.int32).reshape(1, SEQ)                # [1, S]
    tok_blob = jnp.concatenate([cols, mask_row], axis=0)                       # [S+1, S] int32

    args = (tok_blob, params["emb_blob"], params["w32_blob"],
            params["w64_blob"], params["vec_blob"])

    return pl.pallas_call(
        bert_forward_kernel,
        out_shape=jax.ShapeDtypeStruct((1, NUM_WHERE_CONDITIONS), jnp.float32),
        in_specs=[pl.BlockSpec(memory_space=pltpu.MemorySpace.VMEM)] * len(args),
        out_specs=pl.BlockSpec(memory_space=pltpu.MemorySpace.VMEM),
    )(*args)


# ----------------------------------- main --------------------------------------
if __name__ == "__main__":
    key = jax.random.PRNGKey(0)
    k_param, k_ids = jax.random.split(key, 2)

    params = init_params(k_param)

    input_ids = jax.random.randint(k_ids, (SEQ,), 0, VOCAB, dtype=jnp.int32)
    attention_mask = jnp.array([1, 1, 1, 1, 1, 1, 0, 0], dtype=jnp.int32)      # padded tail
    token_type_ids = jnp.array([0, 0, 0, 0, 1, 1, 1, 1], dtype=jnp.int32)

    logits = where_condition_classifier_forward(params, input_ids, attention_mask, token_type_ids)
    logits = jax.block_until_ready(logits)

    assert logits.shape == (1, NUM_WHERE_CONDITIONS)
    assert bool(jnp.all(jnp.isfinite(logits)))
    print("KERNEL_OK")
</pallas_src>

<mosaic_0001>
module attributes {stable_mosaic.version = 11 : i64} {
  func.func @bert_forward_kernel(%arg0: memref<9x8xi32, #tpu.memory_space<vmem>>, %arg1: memref<98x32xf32, #tpu.memory_space<vmem>>, %arg2: memref<3x32x192xbf16, #tpu.memory_space<vmem>>, %arg3: memref<2x64x32xbf16, #tpu.memory_space<vmem>>, %arg4: memref<3x8x96xf32, #tpu.memory_space<vmem>>, %arg5: memref<1x4xf32, #tpu.memory_space<vmem>>) attributes {dimension_semantics = [], scalar_prefetch = 0 : i64, scratch_operands = 0 : i64, tpu.core_type = #tpu.core_type<tc>} {
    %c0 = arith.constant 0 : index
    %c0_0 = arith.constant 0 : index
    %0 = vector.load %arg0[%c0, %c0_0] : memref<9x8xi32, #tpu.memory_space<vmem>>, vector<8x1xi32>
    %c0_1 = arith.constant 0 : index
    %c1 = arith.constant 1 : index
    %1 = vector.load %arg0[%c0_1, %c1] : memref<9x8xi32, #tpu.memory_space<vmem>>, vector<8x1xi32>
    %2 = arith.sitofp %1 : vector<8x1xi32> to vector<8x1xf32>
    %c8 = arith.constant 8 : index
    %c0_2 = arith.constant 0 : index
    %3 = vector.load %arg0[%c8, %c0_2] : memref<9x8xi32, #tpu.memory_space<vmem>>, vector<1x8xi32>
    %4 = arith.sitofp %3 : vector<1x8xi32> to vector<1x8xf32>
    %cst = arith.constant 1.000000e+00 : f32
    %5 = vector.broadcast %cst : f32 to vector<1x8xf32>
    %6 = arith.subf %5, %4 : vector<1x8xf32>
    %cst_3 = arith.constant -1.000000e+04 : f32
    %7 = vector.broadcast %cst_3 : f32 to vector<1x8xf32>
    %8 = arith.mulf %6, %7 : vector<1x8xf32>
    %9 = tpu.iota {dimensions = array<i32: 1>} : vector<8x64xi32>
    %10 = vector.broadcast %0 : vector<8x1xi32> to vector<8x64xi32>
    %11 = arith.cmpi eq, %10, %9 : vector<8x64xi32>
    %12 = arith.extui %11 : vector<8x64xi1> to vector<8x64xi32>
    %13 = arith.sitofp %12 : vector<8x64xi32> to vector<8x64xf32>
    %14 = arith.truncf %13 : vector<8x64xf32> to vector<8x64xbf16>
    %c0_4 = arith.constant 0 : index
    %c0_5 = arith.constant 0 : index
    %15 = vector.load %arg1[%c0_4, %c0_5] : memref<98x32xf32, #tpu.memory_space<vmem>>, vector<64x32xf32>
    %16 = arith.truncf %15 : vector<64x32xf32> to vector<64x32xbf16>
    %cst_6 = arith.constant dense<0.000000e+00> : vector<8x32xf32>
    %17 = tpu.matmul %14, %16, %cst_6 {dimension_numbers = #tpu.dot_dimension_numbers<[1], [0], [0], [1], [0, 0, 1, 1], [], []>} : vector<8x64xbf16>, vector<64x32xbf16>, vector<8x32xf32> -> vector<8x32xf32>
    %c64 = arith.constant 64 : index
    %c0_7 = arith.constant 0 : index
    %18 = vector.load %arg1[%c64, %c0_7] : memref<98x32xf32, #tpu.memory_space<vmem>>, vector<8x32xf32>
    %c96 = arith.constant 96 : index
    %c0_8 = arith.constant 0 : index
    %19 = vector.load %arg1[%c96, %c0_8] : memref<98x32xf32, #tpu.memory_space<vmem>>, vector<1x32xf32>
    %c97 = arith.constant 97 : index
    %c0_9 = arith.constant 0 : index
    %20 = vector.load %arg1[%c97, %c0_9] : memref<98x32xf32, #tpu.memory_space<vmem>>, vector<1x32xf32>
    %cst_10 = arith.constant 1.000000e+00 : f32
    %21 = vector.broadcast %cst_10 : f32 to vector<8x1xf32>
    %22 = arith.subf %21, %2 : vector<8x1xf32>
    %23 = vector.broadcast %22 : vector<8x1xf32> to vector<8x32xf32>
    %24 = vector.broadcast %19 : vector<1x32xf32> to vector<8x32xf32>
    %25 = arith.mulf %23, %24 : vector<8x32xf32>
    %26 = vector.broadcast %2 : vector<8x1xf32> to vector<8x32xf32>
    %27 = vector.broadcast %20 : vector<1x32xf32> to vector<8x32xf32>
    %28 = arith.mulf %26, %27 : vector<8x32xf32>
    %29 = arith.addf %25, %28 : vector<8x32xf32>
    %c2 = arith.constant 2 : index
    %c0_11 = arith.constant 0 : index
    %c0_12 = arith.constant 0 : index
    %30 = vector.load %arg4[%c2, %c0_11, %c0_12] : memref<3x8x96xf32, #tpu.memory_space<vmem>>, vector<1x8x96xf32>
    %31 = vector.shape_cast %30 : vector<1x8x96xf32> to vector<8x96xf32>
    %32 = vector.extract_strided_slice %31 {offsets = [0, 0], sizes = [1, 32], strides = [1, 1]} : vector<8x96xf32> to vector<1x32xf32>
    %33 = vector.extract_strided_slice %31 {offsets = [1, 0], sizes = [1, 32], strides = [1, 1]} : vector<8x96xf32> to vector<1x32xf32>
    %34 = arith.addf %17, %18 : vector<8x32xf32>
    %35 = arith.addf %34, %29 : vector<8x32xf32>
    %cst_13 = arith.constant dense<0.000000e+00> : vector<8xf32>
    %36 = vector.multi_reduction <add>, %35, %cst_13 [1] : vector<8x32xf32> to vector<8xf32>
    %37 = vector.shape_cast %36 : vector<8xf32> to vector<8x1xf32>
    %cst_14 = arith.constant 3.200000e+01 : f32
    %38 = vector.broadcast %cst_14 : f32 to vector<8x1xf32>
    %39 = arith.divf %37, %38 : vector<8x1xf32>
    %40 = vector.broadcast %39 : vector<8x1xf32> to vector<8x32xf32>
    %41 = arith.subf %35, %40 : vector<8x32xf32>
    %42 = arith.mulf %41, %41 : vector<8x32xf32>
    %cst_15 = arith.constant dense<0.000000e+00> : vector<8xf32>
    %43 = vector.multi_reduction <add>, %42, %cst_15 [1] : vector<8x32xf32> to vector<8xf32>
    %44 = vector.shape_cast %43 : vector<8xf32> to vector<8x1xf32>
    %cst_16 = arith.constant 3.200000e+01 : f32
    %45 = vector.broadcast %cst_16 : f32 to vector<8x1xf32>
    %46 = arith.divf %44, %45 : vector<8x1xf32>
    %47 = vector.broadcast %39 : vector<8x1xf32> to vector<8x32xf32>
    %48 = arith.subf %35, %47 : vector<8x32xf32>
    %cst_17 = arith.constant 9.99999996E-13 : f32
    %49 = vector.broadcast %cst_17 : f32 to vector<8x1xf32>
    %50 = arith.addf %46, %49 : vector<8x1xf32>
    %51 = math.rsqrt %50 : vector<8x1xf32>
    %52 = vector.broadcast %51 : vector<8x1xf32> to vector<8x32xf32>
    %53 = arith.mulf %48, %52 : vector<8x32xf32>
    %54 = vector.broadcast %32 : vector<1x32xf32> to vector<8x32xf32>
    %55 = arith.mulf %53, %54 : vector<8x32xf32>
    %56 = vector.broadcast %33 : vector<1x32xf32> to vector<8x32xf32>
    %57 = arith.addf %55, %56 : vector<8x32xf32>
    %c0_18 = arith.constant 0 : index
    %c0_19 = arith.constant 0 : index
    %c0_20 = arith.constant 0 : index
    %58 = vector.load %arg2[%c0_18, %c0_19, %c0_20] : memref<3x32x192xbf16, #tpu.memory_space<vmem>>, vector<1x32x192xbf16>
    %59 = vector.shape_cast %58 : vector<1x32x192xbf16> to vector<32x192xbf16>
    %c0_21 = arith.constant 0 : index
    %c0_22 = arith.constant 0 : index
    %c0_23 = arith.constant 0 : index
    %60 = vector.load %arg4[%c0_21, %c0_22, %c0_23] : memref<3x8x96xf32, #tpu.memory_space<vmem>>, vector<1x8x96xf32>
    %61 = vector.shape_cast %60 : vector<1x8x96xf32> to vector<8x96xf32>
    %62 = vector.extract_strided_slice %61 {offsets = [0, 0], sizes = [1, 96], strides = [1, 1]} : vector<8x96xf32> to vector<1x96xf32>
    %63 = vector.extract_strided_slice %61 {offsets = [1, 0], sizes = [1, 32], strides = [1, 1]} : vector<8x96xf32> to vector<1x32xf32>
    %64 = vector.extract_strided_slice %61 {offsets = [2, 0], sizes = [1, 64], strides = [1, 1]} : vector<8x96xf32> to vector<1x64xf32>
    %65 = vector.extract_strided_slice %61 {offsets = [3, 0], sizes = [1, 32], strides = [1, 1]} : vector<8x96xf32> to vector<1x32xf32>
    %66 = vector.extract_strided_slice %61 {offsets = [4, 0], sizes = [1, 32], strides = [1, 1]} : vector<8x96xf32> to vector<1x32xf32>
    %67 = vector.extract_strided_slice %61 {offsets = [5, 0], sizes = [1, 32], strides = [1, 1]} : vector<8x96xf32> to vector<1x32xf32>
    %68 = vector.extract_strided_slice %61 {offsets = [6, 0], sizes = [1, 32], strides = [1, 1]} : vector<8x96xf32> to vector<1x32xf32>
    %69 = vector.extract_strided_slice %61 {offsets = [7, 0], sizes = [1, 32], strides = [1, 1]} : vector<8x96xf32> to vector<1x32xf32>
    %70 = arith.truncf %57 : vector<8x32xf32> to vector<8x32xbf16>
    %71 = vector.extract_strided_slice %59 {offsets = [0, 0], sizes = [32, 96], strides = [1, 1]} : vector<32x192xbf16> to vector<32x96xbf16>
    %cst_24 = arith.constant dense<0.000000e+00> : vector<8x96xf32>
    %72 = tpu.matmul %70, %71, %cst_24 {dimension_numbers = #tpu.dot_dimension_numbers<[1], [0], [0], [1], [0, 0, 1, 1], [], []>} : vector<8x32xbf16>, vector<32x96xbf16>, vector<8x96xf32> -> vector<8x96xf32>
    %73 = vector.broadcast %62 : vector<1x96xf32> to vector<8x96xf32>
    %74 = arith.addf %72, %73 : vector<8x96xf32>
    %75 = vector.extract_strided_slice %74 {offsets = [0, 0], sizes = [8, 16], strides = [1, 1]} : vector<8x96xf32> to vector<8x16xf32>
    %76 = vector.extract_strided_slice %74 {offsets = [0, 32], sizes = [8, 16], strides = [1, 1]} : vector<8x96xf32> to vector<8x16xf32>
    %77 = vector.extract_strided_slice %74 {offsets = [0, 64], sizes = [8, 16], strides = [1, 1]} : vector<8x96xf32> to vector<8x16xf32>
    %78 = arith.truncf %75 : vector<8x16xf32> to vector<8x16xbf16>
    %79 = arith.truncf %76 : vector<8x16xf32> to vector<8x16xbf16>
    %cst_25 = arith.constant dense<0.000000e+00> : vector<8x8xf32>
    %80 = tpu.matmul %78, %79, %cst_25 {dimension_numbers = #tpu.dot_dimension_numbers<[1], [1], [0], [0], [0, 0, 1, 0], [], []>} : vector<8x16xbf16>, vector<8x16xbf16>, vector<8x8xf32> -> vector<8x8xf32>
    %cst_26 = arith.constant 2.500000e-01 : f32
    %81 = vector.broadcast %cst_26 : f32 to vector<8x8xf32>
    %82 = arith.mulf %80, %81 : vector<8x8xf32>
    %83 = vector.broadcast %8 : vector<1x8xf32> to vector<8x8xf32>
    %84 = arith.addf %82, %83 : vector<8x8xf32>
    %cst_27 = arith.constant dense<0xFF800000> : vector<8xf32>
    %85 = vector.multi_reduction <maximumf>, %84, %cst_27 [1] : vector<8x8xf32> to vector<8xf32>
    %86 = vector.shape_cast %85 : vector<8xf32> to vector<8x1xf32>
    %87 = vector.broadcast %86 : vector<8x1xf32> to vector<8x8xf32>
    %88 = arith.subf %84, %87 : vector<8x8xf32>
    %89 = math.exp %88 : vector<8x8xf32>
    %cst_28 = arith.constant dense<0.000000e+00> : vector<8xf32>
    %90 = vector.multi_reduction <add>, %89, %cst_28 [1] : vector<8x8xf32> to vector<8xf32>
    %91 = vector.shape_cast %90 : vector<8xf32> to vector<8x1xf32>
    %92 = tpu.reciprocal %91 {approx = true} : vector<8x1xf32> -> vector<8x1xf32>
    %93 = vector.broadcast %92 : vector<8x1xf32> to vector<8x8xf32>
    %94 = arith.mulf %89, %93 : vector<8x8xf32>
    %95 = arith.truncf %94 : vector<8x8xf32> to vector<8x8xbf16>
    %96 = arith.truncf %77 : vector<8x16xf32> to vector<8x16xbf16>
    %cst_29 = arith.constant dense<0.000000e+00> : vector<8x16xf32>
    %97 = tpu.matmul %95, %96, %cst_29 {dimension_numbers = #tpu.dot_dimension_numbers<[1], [0], [0], [1], [0, 0, 1, 1], [], []>} : vector<8x8xbf16>, vector<8x16xbf16>, vector<8x16xf32> -> vector<8x16xf32>
    %98 = vector.extract_strided_slice %74 {offsets = [0, 16], sizes = [8, 16], strides = [1, 1]} : vector<8x96xf32> to vector<8x16xf32>
    %99 = vector.extract_strided_slice %74 {offsets = [0, 48], sizes = [8, 16], strides = [1, 1]} : vector<8x96xf32> to vector<8x16xf32>
    %100 = vector.extract_strided_slice %74 {offsets = [0, 80], sizes = [8, 16], strides = [1, 1]} : vector<8x96xf32> to vector<8x16xf32>
    %101 = arith.truncf %98 : vector<8x16xf32> to vector<8x16xbf16>
    %102 = arith.truncf %99 : vector<8x16xf32> to vector<8x16xbf16>
    %cst_30 = arith.constant dense<0.000000e+00> : vector<8x8xf32>
    %103 = tpu.matmul %101, %102, %cst_30 {dimension_numbers = #tpu.dot_dimension_numbers<[1], [1], [0], [0], [0, 0, 1, 0], [], []>} : vector<8x16xbf16>, vector<8x16xbf16>, vector<8x8xf32> -> vector<8x8xf32>
    %cst_31 = arith.constant 2.500000e-01 : f32
    %104 = vector.broadcast %cst_31 : f32 to vector<8x8xf32>
    %105 = arith.mulf %103, %104 : vector<8x8xf32>
    %106 = vector.broadcast %8 : vector<1x8xf32> to vector<8x8xf32>
    %107 = arith.addf %105, %106 : vector<8x8xf32>
    %cst_32 = arith.constant dense<0xFF800000> : vector<8xf32>
    %108 = vector.multi_reduction <maximumf>, %107, %cst_32 [1] : vector<8x8xf32> to vector<8xf32>
    %109 = vector.shape_cast %108 : vector<8xf32> to vector<8x1xf32>
    %110 = vector.broadcast %109 : vector<8x1xf32> to vector<8x8xf32>
    %111 = arith.subf %107, %110 : vector<8x8xf32>
    %112 = math.exp %111 : vector<8x8xf32>
    %cst_33 = arith.constant dense<0.000000e+00> : vector<8xf32>
    %113 = vector.multi_reduction <add>, %112, %cst_33 [1] : vector<8x8xf32> to vector<8xf32>
    %114 = vector.shape_cast %113 : vector<8xf32> to vector<8x1xf32>
    %115 = tpu.reciprocal %114 {approx = true} : vector<8x1xf32> -> vector<8x1xf32>
    %116 = vector.broadcast %115 : vector<8x1xf32> to vector<8x8xf32>
    %117 = arith.mulf %112, %116 : vector<8x8xf32>
    %118 = arith.truncf %117 : vector<8x8xf32> to vector<8x8xbf16>
    %119 = arith.truncf %100 : vector<8x16xf32> to vector<8x16xbf16>
    %cst_34 = arith.constant dense<0.000000e+00> : vector<8x16xf32>
    %120 = tpu.matmul %118, %119, %cst_34 {dimension_numbers = #tpu.dot_dimension_numbers<[1], [0], [0], [1], [0, 0, 1, 1], [], []>} : vector<8x8xbf16>, vector<8x16xbf16>, vector<8x16xf32> -> vector<8x16xf32>
    %121 = tpu.concatenate %97, %120 in 1 : vector<8x16xf32>, vector<8x16xf32> -> vector<8x32xf32>
    %122 = arith.truncf %121 : vector<8x32xf32> to vector<8x32xbf16>
    %123 = vector.extract_strided_slice %59 {offsets = [0, 96], sizes = [32, 32], strides = [1, 1]} : vector<32x192xbf16> to vector<32x32xbf16>
    %cst_35 = arith.constant dense<0.000000e+00> : vector<8x32xf32>
    %124 = tpu.matmul %122, %123, %cst_35 {dimension_numbers = #tpu.dot_dimension_numbers<[1], [0], [0], [1], [0, 0, 1, 1], [], []>} : vector<8x32xbf16>, vector<32x32xbf16>, vector<8x32xf32> -> vector<8x32xf32>
    %125 = vector.broadcast %63 : vector<1x32xf32> to vector<8x32xf32>
    %126 = arith.addf %124, %125 : vector<8x32xf32>
    %127 = arith.addf %126, %57 : vector<8x32xf32>
    %cst_36 = arith.constant dense<0.000000e+00> : vector<8xf32>
    %128 = vector.multi_reduction <add>, %127, %cst_36 [1] : vector<8x32xf32> to vector<8xf32>
    %129 = vector.shape_cast %128 : vector<8xf32> to vector<8x1xf32>
    %cst_37 = arith.constant 3.200000e+01 : f32
    %130 = vector.broadcast %cst_37 : f32 to vector<8x1xf32>
    %131 = arith.divf %129, %130 : vector<8x1xf32>
    %132 = vector.broadcast %131 : vector<8x1xf32> to vector<8x32xf32>
    %133 = arith.subf %127, %132 : vector<8x32xf32>
    %134 = arith.mulf %133, %133 : vector<8x32xf32>
    %cst_38 = arith.constant dense<0.000000e+00> : vector<8xf32>
    %135 = vector.multi_reduction <add>, %134, %cst_38 [1] : vector<8x32xf32> to vector<8xf32>
    %136 = vector.shape_cast %135 : vector<8xf32> to vector<8x1xf32>
    %cst_39 = arith.constant 3.200000e+01 : f32
    %137 = vector.broadcast %cst_39 : f32 to vector<8x1xf32>
    %138 = arith.divf %136, %137 : vector<8x1xf32>
    %139 = vector.broadcast %131 : vector<8x1xf32> to vector<8x32xf32>
    %140 = arith.subf %127, %139 : vector<8x32xf32>
    %cst_40 = arith.constant 9.99999996E-13 : f32
    %141 = vector.broadcast %cst_40 : f32 to vector<8x1xf32>
    %142 = arith.addf %138, %141 : vector<8x1xf32>
    %143 = math.rsqrt %142 : vector<8x1xf32>
    %144 = vector.broadcast %143 : vector<8x1xf32> to vector<8x32xf32>
    %145 = arith.mulf %140, %144 : vector<8x32xf32>
    %146 = vector.broadcast %66 : vector<1x32xf32> to vector<8x32xf32>
    %147 = arith.mulf %145, %146 : vector<8x32xf32>
    %148 = vector.broadcast %67 : vector<1x32xf32> to vector<8x32xf32>
    %149 = arith.addf %147, %148 : vector<8x32xf32>
    %150 = arith.truncf %149 : vector<8x32xf32> to vector<8x32xbf16>
    %151 = vector.extract_strided_slice %59 {offsets = [0, 128], sizes = [32, 64], strides = [1, 1]} : vector<32x192xbf16> to vector<32x64xbf16>
    %cst_41 = arith.constant dense<0.000000e+00> : vector<8x64xf32>
    %152 = tpu.matmul %150, %151, %cst_41 {dimension_numbers = #tpu.dot_dimension_numbers<[1], [0], [0], [1], [0, 0, 1, 1], [], []>} : vector<8x32xbf16>, vector<32x64xbf16>, vector<8x64xf32> -> vector<8x64xf32>
    %153 = vector.broadcast %64 : vector<1x64xf32> to vector<8x64xf32>
    %154 = arith.addf %152, %153 : vector<8x64xf32>
    %155 = arith.mulf %154, %154 : vector<8x64xf32>
    %156 = arith.mulf %154, %155 : vector<8x64xf32>
    %cst_42 = arith.constant 4.471500e-02 : f32
    %157 = vector.broadcast %cst_42 : f32 to vector<8x64xf32>
    %158 = arith.mulf %157, %156 : vector<8x64xf32>
    %159 = arith.addf %154, %158 : vector<8x64xf32>
    %cst_43 = arith.constant 0.797884583 : f32
    %160 = vector.broadcast %cst_43 : f32 to vector<8x64xf32>
    %161 = arith.mulf %160, %159 : vector<8x64xf32>
    %162 = math.tanh %161 : vector<8x64xf32>
    %cst_44 = arith.constant 1.000000e+00 : f32
    %163 = vector.broadcast %cst_44 : f32 to vector<8x64xf32>
    %164 = arith.addf %163, %162 : vector<8x64xf32>
    %cst_45 = arith.constant 5.000000e-01 : f32
    %165 = vector.broadcast %cst_45 : f32 to vector<8x64xf32>
    %166 = arith.mulf %165, %164 : vector<8x64xf32>
    %167 = arith.mulf %154, %166 : vector<8x64xf32>
    %168 = arith.truncf %167 : vector<8x64xf32> to vector<8x64xbf16>
    %c0_46 = arith.constant 0 : index
    %c0_47 = arith.constant 0 : index
    %c0_48 = arith.constant 0 : index
    %169 = vector.load %arg3[%c0_46, %c0_47, %c0_48] : memref<2x64x32xbf16, #tpu.memory_space<vmem>>, vector<1x64x32xbf16>
    %170 = vector.shape_cast %169 : vector<1x64x32xbf16> to vector<64x32xbf16>
    %cst_49 = arith.constant dense<0.000000e+00> : vector<8x32xf32>
    %171 = tpu.matmul %168, %170, %cst_49 {dimension_numbers = #tpu.dot_dimension_numbers<[1], [0], [0], [1], [0, 0, 1, 1], [], []>} : vector<8x64xbf16>, vector<64x32xbf16>, vector<8x32xf32> -> vector<8x32xf32>
    %172 = vector.broadcast %65 : vector<1x32xf32> to vector<8x32xf32>
    %173 = arith.addf %171, %172 : vector<8x32xf32>
    %174 = arith.addf %173, %149 : vector<8x32xf32>
    %cst_50 = arith.constant dense<0.000000e+00> : vector<8xf32>
    %175 = vector.multi_reduction <add>, %174, %cst_50 [1] : vector<8x32xf32> to vector<8xf32>
    %176 = vector.shape_cast %175 : vector<8xf32> to vector<8x1xf32>
    %cst_51 = arith.constant 3.200000e+01 : f32
    %177 = vector.broadcast %cst_51 : f32 to vector<8x1xf32>
    %178 = arith.divf %176, %177 : vector<8x1xf32>
    %179 = vector.broadcast %178 : vector<8x1xf32> to vector<8x32xf32>
    %180 = arith.subf %174, %179 : vector<8x32xf32>
    %181 = arith.mulf %180, %180 : vector<8x32xf32>
    %cst_52 = arith.constant dense<0.000000e+00> : vector<8xf32>
    %182 = vector.multi_reduction <add>, %181, %cst_52 [1] : vector<8x32xf32> to vector<8xf32>
    %183 = vector.shape_cast %182 : vector<8xf32> to vector<8x1xf32>
    %cst_53 = arith.constant 3.200000e+01 : f32
    %184 = vector.broadcast %cst_53 : f32 to vector<8x1xf32>
    %185 = arith.divf %183, %184 : vector<8x1xf32>
    %186 = vector.broadcast %178 : vector<8x1xf32> to vector<8x32xf32>
    %187 = arith.subf %174, %186 : vector<8x32xf32>
    %cst_54 = arith.constant 9.99999996E-13 : f32
    %188 = vector.broadcast %cst_54 : f32 to vector<8x1xf32>
    %189 = arith.addf %185, %188 : vector<8x1xf32>
    %190 = math.rsqrt %189 : vector<8x1xf32>
    %191 = vector.broadcast %190 : vector<8x1xf32> to vector<8x32xf32>
    %192 = arith.mulf %187, %191 : vector<8x32xf32>
    %193 = vector.broadcast %68 : vector<1x32xf32> to vector<8x32xf32>
    %194 = arith.mulf %192, %193 : vector<8x32xf32>
    %195 = vector.broadcast %69 : vector<1x32xf32> to vector<8x32xf32>
    %196 = arith.addf %194, %195 : vector<8x32xf32>
    %c1_55 = arith.constant 1 : index
    %c0_56 = arith.constant 0 : index
    %c0_57 = arith.constant 0 : index
    %197 = vector.load %arg2[%c1_55, %c0_56, %c0_57] : memref<3x32x192xbf16, #tpu.memory_space<vmem>>, vector<1x32x192xbf16>
    %198 = vector.shape_cast %197 : vector<1x32x192xbf16> to vector<32x192xbf16>
    %c1_58 = arith.constant 1 : index
    %c0_59 = arith.constant 0 : index
    %c0_60 = arith.constant 0 : index
    %199 = vector.load %arg4[%c1_58, %c0_59, %c0_60] : memref<3x8x96xf32, #tpu.memory_space<vmem>>, vector<1x8x96xf32>
    %200 = vector.shape_cast %199 : vector<1x8x96xf32> to vector<8x96xf32>
    %201 = vector.extract_strided_slice %200 {offsets = [0, 0], sizes = [1, 96], strides = [1, 1]} : vector<8x96xf32> to vector<1x96xf32>
    %202 = vector.extract_strided_slice %200 {offsets = [1, 0], sizes = [1, 32], strides = [1, 1]} : vector<8x96xf32> to vector<1x32xf32>
    %203 = vector.extract_strided_slice %200 {offsets = [2, 0], sizes = [1, 64], strides = [1, 1]} : vector<8x96xf32> to vector<1x64xf32>
    %204 = vector.extract_strided_slice %200 {offsets = [3, 0], sizes = [1, 32], strides = [1, 1]} : vector<8x96xf32> to vector<1x32xf32>
    %205 = vector.extract_strided_slice %200 {offsets = [4, 0], sizes = [1, 32], strides = [1, 1]} : vector<8x96xf32> to vector<1x32xf32>
    %206 = vector.extract_strided_slice %200 {offsets = [5, 0], sizes = [1, 32], strides = [1, 1]} : vector<8x96xf32> to vector<1x32xf32>
    %207 = vector.extract_strided_slice %200 {offsets = [6, 0], sizes = [1, 32], strides = [1, 1]} : vector<8x96xf32> to vector<1x32xf32>
    %208 = vector.extract_strided_slice %200 {offsets = [7, 0], sizes = [1, 32], strides = [1, 1]} : vector<8x96xf32> to vector<1x32xf32>
    %209 = arith.truncf %196 : vector<8x32xf32> to vector<8x32xbf16>
    %210 = vector.extract_strided_slice %198 {offsets = [0, 0], sizes = [32, 96], strides = [1, 1]} : vector<32x192xbf16> to vector<32x96xbf16>
    %cst_61 = arith.constant dense<0.000000e+00> : vector<8x96xf32>
    %211 = tpu.matmul %209, %210, %cst_61 {dimension_numbers = #tpu.dot_dimension_numbers<[1], [0], [0], [1], [0, 0, 1, 1], [], []>} : vector<8x32xbf16>, vector<32x96xbf16>, vector<8x96xf32> -> vector<8x96xf32>
    %212 = vector.broadcast %201 : vector<1x96xf32> to vector<8x96xf32>
    %213 = arith.addf %211, %212 : vector<8x96xf32>
    %214 = vector.extract_strided_slice %213 {offsets = [0, 0], sizes = [8, 16], strides = [1, 1]} : vector<8x96xf32> to vector<8x16xf32>
    %215 = vector.extract_strided_slice %213 {offsets = [0, 32], sizes = [8, 16], strides = [1, 1]} : vector<8x96xf32> to vector<8x16xf32>
    %216 = vector.extract_strided_slice %213 {offsets = [0, 64], sizes = [8, 16], strides = [1, 1]} : vector<8x96xf32> to vector<8x16xf32>
    %217 = arith.truncf %214 : vector<8x16xf32> to vector<8x16xbf16>
    %218 = arith.truncf %215 : vector<8x16xf32> to vector<8x16xbf16>
    %cst_62 = arith.constant dense<0.000000e+00> : vector<8x8xf32>
    %219 = tpu.matmul %217, %218, %cst_62 {dimension_numbers = #tpu.dot_dimension_numbers<[1], [1], [0], [0], [0, 0, 1, 0], [], []>} : vector<8x16xbf16>, vector<8x16xbf16>, vector<8x8xf32> -> vector<8x8xf32>
    %cst_63 = arith.constant 2.500000e-01 : f32
    %220 = vector.broadcast %cst_63 : f32 to vector<8x8xf32>
    %221 = arith.mulf %219, %220 : vector<8x8xf32>
    %222 = vector.broadcast %8 : vector<1x8xf32> to vector<8x8xf32>
    %223 = arith.addf %221, %222 : vector<8x8xf32>
    %cst_64 = arith.constant dense<0xFF800000> : vector<8xf32>
    %224 = vector.multi_reduction <maximumf>, %223, %cst_64 [1] : vector<8x8xf32> to vector<8xf32>
    %225 = vector.shape_cast %224 : vector<8xf32> to vector<8x1xf32>
    %226 = vector.broadcast %225 : vector<8x1xf32> to vector<8x8xf32>
    %227 = arith.subf %223, %226 : vector<8x8xf32>
    %228 = math.exp %227 : vector<8x8xf32>
    %cst_65 = arith.constant dense<0.000000e+00> : vector<8xf32>
    %229 = vector.multi_reduction <add>, %228, %cst_65 [1] : vector<8x8xf32> to vector<8xf32>
    %230 = vector.shape_cast %229 : vector<8xf32> to vector<8x1xf32>
    %231 = tpu.reciprocal %230 {approx = true} : vector<8x1xf32> -> vector<8x1xf32>
    %232 = vector.broadcast %231 : vector<8x1xf32> to vector<8x8xf32>
    %233 = arith.mulf %228, %232 : vector<8x8xf32>
    %234 = arith.truncf %233 : vector<8x8xf32> to vector<8x8xbf16>
    %235 = arith.truncf %216 : vector<8x16xf32> to vector<8x16xbf16>
    %cst_66 = arith.constant dense<0.000000e+00> : vector<8x16xf32>
    %236 = tpu.matmul %234, %235, %cst_66 {dimension_numbers = #tpu.dot_dimension_numbers<[1], [0], [0], [1], [0, 0, 1, 1], [], []>} : vector<8x8xbf16>, vector<8x16xbf16>, vector<8x16xf32> -> vector<8x16xf32>
    %237 = vector.extract_strided_slice %213 {offsets = [0, 16], sizes = [8, 16], strides = [1, 1]} : vector<8x96xf32> to vector<8x16xf32>
    %238 = vector.extract_strided_slice %213 {offsets = [0, 48], sizes = [8, 16], strides = [1, 1]} : vector<8x96xf32> to vector<8x16xf32>
    %239 = vector.extract_strided_slice %213 {offsets = [0, 80], sizes = [8, 16], strides = [1, 1]} : vector<8x96xf32> to vector<8x16xf32>
    %240 = arith.truncf %237 : vector<8x16xf32> to vector<8x16xbf16>
    %241 = arith.truncf %238 : vector<8x16xf32> to vector<8x16xbf16>
    %cst_67 = arith.constant dense<0.000000e+00> : vector<8x8xf32>
    %242 = tpu.matmul %240, %241, %cst_67 {dimension_numbers = #tpu.dot_dimension_numbers<[1], [1], [0], [0], [0, 0, 1, 0], [], []>} : vector<8x16xbf16>, vector<8x16xbf16>, vector<8x8xf32> -> vector<8x8xf32>
    %cst_68 = arith.constant 2.500000e-01 : f32
    %243 = vector.broadcast %cst_68 : f32 to vector<8x8xf32>
    %244 = arith.mulf %242, %243 : vector<8x8xf32>
    %245 = vector.broadcast %8 : vector<1x8xf32> to vector<8x8xf32>
    %246 = arith.addf %244, %245 : vector<8x8xf32>
    %cst_69 = arith.constant dense<0xFF800000> : vector<8xf32>
    %247 = vector.multi_reduction <maximumf>, %246, %cst_69 [1] : vector<8x8xf32> to vector<8xf32>
    %248 = vector.shape_cast %247 : vector<8xf32> to vector<8x1xf32>
    %249 = vector.broadcast %248 : vector<8x1xf32> to vector<8x8xf32>
    %250 = arith.subf %246, %249 : vector<8x8xf32>
    %251 = math.exp %250 : vector<8x8xf32>
    %cst_70 = arith.constant dense<0.000000e+00> : vector<8xf32>
    %252 = vector.multi_reduction <add>, %251, %cst_70 [1] : vector<8x8xf32> to vector<8xf32>
    %253 = vector.shape_cast %252 : vector<8xf32> to vector<8x1xf32>
    %254 = tpu.reciprocal %253 {approx = true} : vector<8x1xf32> -> vector<8x1xf32>
    %255 = vector.broadcast %254 : vector<8x1xf32> to vector<8x8xf32>
    %256 = arith.mulf %251, %255 : vector<8x8xf32>
    %257 = arith.truncf %256 : vector<8x8xf32> to vector<8x8xbf16>
    %258 = arith.truncf %239 : vector<8x16xf32> to vector<8x16xbf16>
    %cst_71 = arith.constant dense<0.000000e+00> : vector<8x16xf32>
    %259 = tpu.matmul %257, %258, %cst_71 {dimension_numbers = #tpu.dot_dimension_numbers<[1], [0], [0], [1], [0, 0, 1, 1], [], []>} : vector<8x8xbf16>, vector<8x16xbf16>, vector<8x16xf32> -> vector<8x16xf32>
    %260 = tpu.concatenate %236, %259 in 1 : vector<8x16xf32>, vector<8x16xf32> -> vector<8x32xf32>
    %261 = arith.truncf %260 : vector<8x32xf32> to vector<8x32xbf16>
    %262 = vector.extract_strided_slice %198 {offsets = [0, 96], sizes = [32, 32], strides = [1, 1]} : vector<32x192xbf16> to vector<32x32xbf16>
    %cst_72 = arith.constant dense<0.000000e+00> : vector<8x32xf32>
    %263 = tpu.matmul %261, %262, %cst_72 {dimension_numbers = #tpu.dot_dimension_numbers<[1], [0], [0], [1], [0, 0, 1, 1], [], []>} : vector<8x32xbf16>, vector<32x32xbf16>, vector<8x32xf32> -> vector<8x32xf32>
    %264 = vector.broadcast %202 : vector<1x32xf32> to vector<8x32xf32>
    %265 = arith.addf %263, %264 : vector<8x32xf32>
    %266 = arith.addf %265, %196 : vector<8x32xf32>
    %cst_73 = arith.constant dense<0.000000e+00> : vector<8xf32>
    %267 = vector.multi_reduction <add>, %266, %cst_73 [1] : vector<8x32xf32> to vector<8xf32>
    %268 = vector.shape_cast %267 : vector<8xf32> to vector<8x1xf32>
    %cst_74 = arith.constant 3.200000e+01 : f32
    %269 = vector.broadcast %cst_74 : f32 to vector<8x1xf32>
    %270 = arith.divf %268, %269 : vector<8x1xf32>
    %271 = vector.broadcast %270 : vector<8x1xf32> to vector<8x32xf32>
    %272 = arith.subf %266, %271 : vector<8x32xf32>
    %273 = arith.mulf %272, %272 : vector<8x32xf32>
    %cst_75 = arith.constant dense<0.000000e+00> : vector<8xf32>
    %274 = vector.multi_reduction <add>, %273, %cst_75 [1] : vector<8x32xf32> to vector<8xf32>
    %275 = vector.shape_cast %274 : vector<8xf32> to vector<8x1xf32>
    %cst_76 = arith.constant 3.200000e+01 : f32
    %276 = vector.broadcast %cst_76 : f32 to vector<8x1xf32>
    %277 = arith.divf %275, %276 : vector<8x1xf32>
    %278 = vector.broadcast %270 : vector<8x1xf32> to vector<8x32xf32>
    %279 = arith.subf %266, %278 : vector<8x32xf32>
    %cst_77 = arith.constant 9.99999996E-13 : f32
    %280 = vector.broadcast %cst_77 : f32 to vector<8x1xf32>
    %281 = arith.addf %277, %280 : vector<8x1xf32>
    %282 = math.rsqrt %281 : vector<8x1xf32>
    %283 = vector.broadcast %282 : vector<8x1xf32> to vector<8x32xf32>
    %284 = arith.mulf %279, %283 : vector<8x32xf32>
    %285 = vector.broadcast %205 : vector<1x32xf32> to vector<8x32xf32>
    %286 = arith.mulf %284, %285 : vector<8x32xf32>
    %287 = vector.broadcast %206 : vector<1x32xf32> to vector<8x32xf32>
    %288 = arith.addf %286, %287 : vector<8x32xf32>
    %289 = arith.truncf %288 : vector<8x32xf32> to vector<8x32xbf16>
    %290 = vector.extract_strided_slice %198 {offsets = [0, 128], sizes = [32, 64], strides = [1, 1]} : vector<32x192xbf16> to vector<32x64xbf16>
    %cst_78 = arith.constant dense<0.000000e+00> : vector<8x64xf32>
    %291 = tpu.matmul %289, %290, %cst_78 {dimension_numbers = #tpu.dot_dimension_numbers<[1], [0], [0], [1], [0, 0, 1, 1], [], []>} : vector<8x32xbf16>, vector<32x64xbf16>, vector<8x64xf32> -> vector<8x64xf32>
    %292 = vector.broadcast %203 : vector<1x64xf32> to vector<8x64xf32>
    %293 = arith.addf %291, %292 : vector<8x64xf32>
    %294 = arith.mulf %293, %293 : vector<8x64xf32>
    %295 = arith.mulf %293, %294 : vector<8x64xf32>
    %cst_79 = arith.constant 4.471500e-02 : f32
    %296 = vector.broadcast %cst_79 : f32 to vector<8x64xf32>
    %297 = arith.mulf %296, %295 : vector<8x64xf32>
    %298 = arith.addf %293, %297 : vector<8x64xf32>
    %cst_80 = arith.constant 0.797884583 : f32
    %299 = vector.broadcast %cst_80 : f32 to vector<8x64xf32>
    %300 = arith.mulf %299, %298 : vector<8x64xf32>
    %301 = math.tanh %300 : vector<8x64xf32>
    %cst_81 = arith.constant 1.000000e+00 : f32
    %302 = vector.broadcast %cst_81 : f32 to vector<8x64xf32>
    %303 = arith.addf %302, %301 : vector<8x64xf32>
    %cst_82 = arith.constant 5.000000e-01 : f32
    %304 = vector.broadcast %cst_82 : f32 to vector<8x64xf32>
    %305 = arith.mulf %304, %303 : vector<8x64xf32>
    %306 = arith.mulf %293, %305 : vector<8x64xf32>
    %307 = arith.truncf %306 : vector<8x64xf32> to vector<8x64xbf16>
    %c1_83 = arith.constant 1 : index
    %c0_84 = arith.constant 0 : index
    %c0_85 = arith.constant 0 : index
    %308 = vector.load %arg3[%c1_83, %c0_84, %c0_85] : memref<2x64x32xbf16, #tpu.memory_space<vmem>>, vector<1x64x32xbf16>
    %309 = vector.shape_cast %308 : vector<1x64x32xbf16> to vector<64x32xbf16>
    %cst_86 = arith.constant dense<0.000000e+00> : vector<8x32xf32>
    %310 = tpu.matmul %307, %309, %cst_86 {dimension_numbers = #tpu.dot_dimension_numbers<[1], [0], [0], [1], [0, 0, 1, 1], [], []>} : vector<8x64xbf16>, vector<64x32xbf16>, vector<8x32xf32> -> vector<8x32xf32>
    %311 = vector.broadcast %204 : vector<1x32xf32> to vector<8x32xf32>
    %312 = arith.addf %310, %311 : vector<8x32xf32>
    %313 = arith.addf %312, %288 : vector<8x32xf32>
    %cst_87 = arith.constant dense<0.000000e+00> : vector<8xf32>
    %314 = vector.multi_reduction <add>, %313, %cst_87 [1] : vector<8x32xf32> to vector<8xf32>
    %315 = vector.shape_cast %314 : vector<8xf32> to vector<8x1xf32>
    %cst_88 = arith.constant 3.200000e+01 : f32
    %316 = vector.broadcast %cst_88 : f32 to vector<8x1xf32>
    %317 = arith.divf %315, %316 : vector<8x1xf32>
    %318 = vector.broadcast %317 : vector<8x1xf32> to vector<8x32xf32>
    %319 = arith.subf %313, %318 : vector<8x32xf32>
    %320 = arith.mulf %319, %319 : vector<8x32xf32>
    %cst_89 = arith.constant dense<0.000000e+00> : vector<8xf32>
    %321 = vector.multi_reduction <add>, %320, %cst_89 [1] : vector<8x32xf32> to vector<8xf32>
    %322 = vector.shape_cast %321 : vector<8xf32> to vector<8x1xf32>
    %cst_90 = arith.constant 3.200000e+01 : f32
    %323 = vector.broadcast %cst_90 : f32 to vector<8x1xf32>
    %324 = arith.divf %322, %323 : vector<8x1xf32>
    %325 = vector.broadcast %317 : vector<8x1xf32> to vector<8x32xf32>
    %326 = arith.subf %313, %325 : vector<8x32xf32>
    %cst_91 = arith.constant 9.99999996E-13 : f32
    %327 = vector.broadcast %cst_91 : f32 to vector<8x1xf32>
    %328 = arith.addf %324, %327 : vector<8x1xf32>
    %329 = math.rsqrt %328 : vector<8x1xf32>
    %330 = vector.broadcast %329 : vector<8x1xf32> to vector<8x32xf32>
    %331 = arith.mulf %326, %330 : vector<8x32xf32>
    %332 = vector.broadcast %207 : vector<1x32xf32> to vector<8x32xf32>
    %333 = arith.mulf %331, %332 : vector<8x32xf32>
    %334 = vector.broadcast %208 : vector<1x32xf32> to vector<8x32xf32>
    %335 = arith.addf %333, %334 : vector<8x32xf32>
    %c2_92 = arith.constant 2 : index
    %c0_93 = arith.constant 0 : index
    %c0_94 = arith.constant 0 : index
    %336 = vector.load %arg2[%c2_92, %c0_93, %c0_94] : memref<3x32x192xbf16, #tpu.memory_space<vmem>>, vector<1x32x192xbf16>
    %337 = vector.shape_cast %336 : vector<1x32x192xbf16> to vector<32x192xbf16>
    %338 = vector.extract_strided_slice %337 {offsets = [0, 0], sizes = [32, 32], strides = [1, 1]} : vector<32x192xbf16> to vector<32x32xbf16>
    %339 = vector.extract_strided_slice %337 {offsets = [0, 32], sizes = [32, 4], strides = [1, 1]} : vector<32x192xbf16> to vector<32x4xbf16>
    %340 = vector.extract_strided_slice %31 {offsets = [2, 0], sizes = [1, 32], strides = [1, 1]} : vector<8x96xf32> to vector<1x32xf32>
    %341 = vector.extract_strided_slice %31 {offsets = [3, 0], sizes = [1, 4], strides = [1, 1]} : vector<8x96xf32> to vector<1x4xf32>
    %342 = vector.extract_strided_slice %335 {offsets = [0, 0], sizes = [1, 32], strides = [1, 1]} : vector<8x32xf32> to vector<1x32xf32>
    %343 = arith.truncf %342 : vector<1x32xf32> to vector<1x32xbf16>
    %cst_95 = arith.constant dense<0.000000e+00> : vector<1x32xf32>
    %344 = tpu.matmul %343, %338, %cst_95 {dimension_numbers = #tpu.dot_dimension_numbers<[1], [0], [0], [1], [0, 0, 1, 1], [], []>} : vector<1x32xbf16>, vector<32x32xbf16>, vector<1x32xf32> -> vector<1x32xf32>
    %345 = arith.addf %344, %340 : vector<1x32xf32>
    %346 = math.tanh %345 : vector<1x32xf32>
    %347 = arith.truncf %346 : vector<1x32xf32> to vector<1x32xbf16>
    %cst_96 = arith.constant dense<0.000000e+00> : vector<1x4xf32>
    %348 = tpu.matmul %347, %339, %cst_96 {dimension_numbers = #tpu.dot_dimension_numbers<[1], [0], [0], [1], [0, 0, 1, 1], [], []>} : vector<1x32xbf16>, vector<32x4xbf16>, vector<1x4xf32> -> vector<1x4xf32>
    %349 = arith.addf %348, %341 : vector<1x4xf32>
    %c0_97 = arith.constant 0 : index
    %c0_98 = arith.constant 0 : index
    %350 = vector.load %arg5[%c0_97, %c0_98] : memref<1x4xf32, #tpu.memory_space<vmem>>, vector<1x4xf32>
    tpu.vector_store %arg5[%c0_97, %c0_98], %349 {strides = array<i32>} : memref<1x4xf32, #tpu.memory_space<vmem>>, vector<1x4xf32>,
    return
  }
}

</mosaic_0001>

<bundles_post_ra>
// kernel: where_condition_classifier_forward.1
= control target key start
LH: loop header
LB: loop body
LE: loop exit
PB: predicated region body
PF: predicated region fallthrough
CT: control target
= control target key end

     0   :  { %v1723_v3 = vmov 0   ;;  %v1724_v4 = vmov 0.0   ;;  %vm1725_vm0 = vmmov 0   ;;  %v1726_v11 = vmov 1   ;;  %s2113_s0 = inlined_call_operand.vmem [shape: s32[9,8], index: 0, kind: input, shape index: {}]   ;;  %s2114_s1 = inlined_call_operand.vmem [shape: f32[98,32], index: 1, kind: input, shape index: {}]   ;;  %s2115_s2 = inlined_call_operand.vmem [shape: bf16[3,32,192], index: 2, kind: input, shape index: {}]   ;;  %s2116_s3 = inlined_call_operand.vmem [shape: bf16[2,64,32], index: 3, kind: input, shape index: {}]   ;;  %s2117_s4 = inlined_call_operand.vmem [shape: f32[3,8,96], index: 4, kind: input, shape index: {}]   ;;  %s2118_s5 = inlined_call_operand.hbm [shape: f32[1,4], index: 5, kind: output, shape index: {}]  }
   0x1   :  { %v22_v0 = vld [vmem:[%s2113_s0] sm:$0xff]  ;;  %v43_v1 = vld [vmem:[%s2114_s1 + $0x30] sm:$0xff]  ;;  %v44_v2 = vld [vmem:[%s2114_s1 + $0x38] sm:$0xff]  ;;  %1644 = vset.pattern.permute.xlu0 %v1723_v3  ;;  %1484 = vmatprep.subr.bf16.mxu0 %v1724_v4 }
   0x2   :  { %v48_v5 = vpack.c.bf16 %v44_v2, %v43_v1  ;;  %v41_v6 = vld [vmem:[%s2114_s1 + $0x20] sm:$0xff]  ;;  %v42_v7 = vld [vmem:[%s2114_s1 + $0x28] sm:$0xff]  ;;  %31 = vperm.xlu0 %1644, %v22_v0   ;;  %1492 = vmatprep.mubr.msk.bf16.mxu0 %vm1725_vm0, %v1724_v4  ;;  %v39_v9 = vld [vmem:[%s2114_s1 + $0x10] sm:$0xff]  ;;  %v23_v12 = vcvt.s32.f32 %v22_v0 }
   0x3   :  { %v47_v8 = vpack.c.bf16 %v42_v7, %v41_v6  ;;  %v40_v10 = vld [vmem:[%s2114_s1 + $0x18] sm:$0xff]  ;;  %1646 = vset.pattern.permute.xlu1 %v1726_v11  ;;  %1496 = vmatprep.subr.bf16.mxu1 %v1724_v4  ;;  %v37_v14 = vld [vmem:[%s2114_s1] sm:$0xff]  ;;  %v38_v15 = vld [vmem:[%s2114_s1 + $0x8] sm:$0xff] }
   0x4   :  { %1485 = vmatpush3.bf16.msra.mxu0 %v48_v5  ;;  %65 = vperm.xlu1 %1646, %v23_v12   ;;  %v52_v13 = vsub.f32 1.0, %v23_v12  ;;  %v46_v16 = vpack.c.bf16 %v40_v10, %v39_v9  ;;  %v45_v17 = vpack.c.bf16 %v38_v15, %v37_v14 }
   0x5   :  { %1486 = vmatprep.subr.bf16.mxu0 %v1724_v4  ;;  %1500 = vmatprep.mubr.msk.bf16.mxu1 %vm1725_vm0, %v1724_v4 }
   0x6   :  { %1645 = vset.pattern.permute.xlu0 %v1726_v11 }
   0x7   :  { %55 = vperm.xlu0 %1645, %v52_v13  }
   0x8   :  { %1487 = vmatpush3.bf16.msra.mxu0 %v47_v8 }
   0x9   :  { %1488 = vmatprep.subr.bf16.mxu0 %v1724_v4 }
   0xc   :  { %1489 = vmatpush3.bf16.msra.mxu0 %v46_v16 }
   0xd   :  { %1490 = vmatprep.subr.bf16.mxu0 %v1724_v4 }
   0xe   :  { %10 = vsyncpa [#allocation3], 0  ;;  %v28_v18 = vlaneseq  ;;  %vm76_vm2 = vcmask 523264   ;;  %v1373_v23 = vld [vmem:[%s2114_s1 + $0x61] ss:$0 sm:$0xff]  ;;  %vm121_vm3 = vcmask 261120  }
   0xf   :  { %v1372_v25 = vld [vmem:[%s2114_s1 + $0x60] ss:$0 sm:$0xff]  ;;  %v1820_v43 = vld [vmem:[%s2115_s2 + $0x10] ss:$8 sps:$4 sm:$0xff]   ;;  %s1727_s24 = smov 80   ;;  %s1728_s25 = smov 96  }
  0x10   :  { %1491 = vmatpush3.bf16.msra.mxu0 %v45_v17  ;;  %v29_v19 = vand.u32 127, %v28_v18  ;;  %v49_v29 = vld [vmem:[%s2114_s1 + $0x40] sm:$0xff]  ;;  %1497 = vmatpush3.bf16.msra.mxu1 %v1820_v43  ;;  %v1831_v48 = vshrl.u32 %v28_v18, 7  ;;  %v1839_v50 = vld [vmem:[%s2117_s4 + $0x10] sm:$0xff]  ;;  %s1729_s26 = smov 112   ;;  %vm215_vm4 = vcmask 130048  }
  0x11   :  { %1510 = vmatprep.subr.bf16.mxu0 %v1724_v4  ;;  %v1826_v44 = vld [vmem:[%s2115_s2] ss:$8 sps:$4 sm:$0xff]   ;;  %1498 = vmatprep.subr.bf16.mxu1 %v1724_v4  ;;  %vm268_vm5 = vcmask 64512   ;;  %s1731_s29 = smov 48   ;;  %vm286_vm6 = vcmask 1043456   ;;  %s1732_s9 = smov 32  }
  0x12   :  { %v1834_v49 = vsub.s32 0, %v1831_v48  ;;  %v1842_v51 = vsub.s32 1, %v1831_v48  ;;  %v1858_v59 = vld [vmem:[%s2117_s4] sm:$0xff]  ;;  %v24_v9 = vld [vmem:[%s2113_s0 + $0x8] sm:$0x1]  ;;  %s1730_s0 = smov 64  }
  0x13   :  { %v25_v10 = vcvt.s32.f32 %v24_v9  ;;  %s1733_s10 = smov 16   ;;  %vm1355_vm7 = vcmask 24576  }
  0x14   :  { %1499 = vmatpush3.bf16.msra.mxu1 %v1826_v44  ;;  %v139_v52 = vrot.slane %v1839_v50, %v1834_v49  ;;  %v144_v55 = vrot.slane %v1839_v50, %v1842_v51  ;;  %v155_v60 = vrot.slane %v1858_v59, %v1834_v49 }
  0x15   :  { %1504 = vmatprep.subr.bf16.mxu1 %v1724_v4  ;;  %v26_v11 = vsub.f32 1.0, %v25_v10 }
  0x17   :  { %v27_v12 = vmul.f32 -10000.0, %v26_v11 }
  0x19   :  { %v1879_v13 = vrot.slane %v27_v12, %v1834_v49 }
  0x7d   :  { %v32_v20 = vpop.permute.xlu0 %31 }
  0x7e   :  { %vm33_vm1 = vcmp.eq.s32.totalorder %v32_v20, %v29_v19 }
  0x7f   :  { %v1371_v21 = vsel %vm33_vm1, 1.0, %v1724_v4  ;;  %v66_v24 = vpop.permute.xlu1 %65 }
  0x80   :  { %v36_v22 = vpack.c.bf16 %v1371_v21, %v1371_v21  ;;  %v72_v27 = vmul.f32 %v1373_v23, %v66_v24 }
  0x82   :  { %1493 = vmatmul.mubr.msk.bf16.vlgmr.msra.gmra.mxu0 %vm76_vm2, %v36_v22  ;;  %v56_v26 = vpop.permute.xlu0 %55 }
  0x83   :  { %1512 = vmatprep.mubr.msk.bf16.mxu0 %vm1725_vm0, %v1724_v4  ;;  %v62_v28 = vmul.f32 %v1372_v25, %v56_v26 }
  0x85   :  { %v73_v30 = vadd.f32 %v72_v27, %v62_v28 }
 0x142   :  { %v114_v31 = vpop.f32.mrf.mxu0 }
 0x143   :  { %v115_v32 = vadd.f32 %v114_v31, %v49_v29 }
 0x144   :  { %v1494_v33 = vpop.f32.mrf.mxu0 }
 0x145   :  { %v120_v34 = vadd.f32 %v115_v32, %v73_v30 }
 0x146   :  { %v117_v35 = vpop.f32.mrf.mxu0 }
 0x147   :  { %v122_v36 = vsel %vm121_vm3, %v120_v34, 0.0 }
 0x148   :  { %v1495_v37 = vpop.f32.mrf.mxu0  ;;  %123 = vadd.xlane.f32.xlu1 %v122_v36 }
 0x1d1   :  { %v124_v38 = vpop.xlane.xlu1 %123 }
 0x1d2   :  { %v126_v39 = vmul.f32 0.03125, %v124_v38 }
 0x1d4   :  { %v127_v40 = vsub.f32 %v120_v34, %v126_v39 }
 0x1d6   :  { %v128_v41 = vmul.f32 %v127_v40, %v127_v40 }
 0x1d8   :  { %v129_v42 = vsel %vm121_vm3, %v128_v41, 0.0 }
 0x1d9   :  { %130 = vadd.xlane.f32.xlu0 %v129_v42 }
 0x262   :  { %v131_v45 = vpop.xlane.xlu0 %130 }
 0x263   :  { %v132_v46 = vmul.f32 0.03125, %v131_v45 }
 0x265   :  { %v133_v47 = vadd.f32 1e-12, %v132_v46 }
 0x267   :  { %1669 = vrsqrt.f32 %v133_v47 }
 0x274   :  { %v1670_v53 = vpop.eup %1669 }
 0x275   :  { %v135_v54 = vmul.f32 %v1670_v53, %v127_v40 }
 0x277   :  { %v140_v56 = vmul.f32 %v139_v52, %v135_v54 }
 0x279   :  { %v1848_v57 = vadd.f32 %v144_v55, %v140_v56  ;;  %v1649_v55 = vld [vmem:[%s2115_s2 + $0x14] ss:$8 sps:$4 sm:$0xff]  }
 0x27b   :  { %v151_v58 = vpack.c.bf16 %v1848_v57, %v1848_v57 }
 0x27d   :  { %1501 = vmatmul.mubr.msk.bf16.vlgmr.msra.gmra.mxu1 %vm121_vm3, %v151_v58  ;;  %v1652_v58 = vld [vmem:[%s2115_s2 + $0x4] ss:$8 sps:$4 sm:$0xff]  }
 0x27e   :  { %1506 = vmatprep.mubr.msk.bf16.mxu1 %vm1725_vm0, %v1724_v4 }
 0x33d   :  { %v205_v61 = vpop.f32.mrf.mxu1 }
 0x33e   :  { %v206_v62 = vadd.f32 %v205_v61, %v155_v60 }
 0x33f   :  { %v1502_v63 = vpop.f32.mrf.mxu1 }
 0x340   :  { %v211_v0 = vpack.c.bf16 %v206_v62, %v206_v62 }
 0x341   :  { %v208_v1 = vpop.f32.mrf.mxu1 }
 0x342   :  { %332 = vrot.lane.b32.xlu0 %v211_v0, %s1727_s24  ;;  %213 = vrot.lane.b32.xlu1 %v211_v0, %s1728_s25 }
 0x343   :  { %v1503_v2 = vpop.f32.mrf.mxu1 }
 0x346   :  { %330 = vrot.lane.b32.xlu1 %v211_v0, %s1729_s26 }
 0x3b4   :  { %v214_v3 = vpop.permute.xlu1 %213  ;;  %v333_v6 = vpop.permute.xlu0 %332 }
 0x3b5   :  { %v220_v5 = vsel %vm215_vm4, %v214_v3, 0  ;;  %v338_v7 = vsel %vm215_vm4, %v333_v6, 0 }
 0x3b6   :  { %1505 = vmatpush3.bf16.xpose.msra.mxu1 %v220_v5 }
 0x3b7   :  { %1516 = vmatprep.subr.bf16.mxu1 %v1724_v4 }
 0x3b8   :  { %v331_v8 = vpop.permute.xlu1 %330 }
 0x3bd   :  { %1507 = vmatmul.mubr.msk.bf16.vlgmr.msra.gmra.mxu1 %vm215_vm4, %v211_v0 }
 0x3be   :  { %1517 = vmatpush3.bf16.xpose.msra.mxu1 %v338_v7  ;;  %1518 = vmatprep.mubr.msk.bf16.mxu1 %vm1725_vm0, %v1724_v4 }
 0x3bf   :  { %1528 = vmatprep.subr.bf16.mxu1 %v1724_v4 }
 0x3c5   :  { %1519 = vmatmul.mubr.msk.bf16.vlgmr.msra.gmra.mxu1 %vm215_vm4, %v331_v8  ;;  %v451_v8 = vrot.slane %v1858_v59, %v1842_v51 }
 0x3c6   :  { %1532 = vmatprep.mubr.msk.bf16.mxu1 %vm1725_vm0, %v1724_v4 }
 0x47d   :  { %v256_v14 = vpop.f32.mrf.mxu1 }
 0x47e   :  { %v262_v15 = vmul.f32 0.25, %v256_v14 }
 0x47f   :  { %v1508_v16 = vpop.f32.mrf.mxu1 }
 0x480   :  { %v267_v17 = vadd.f32 %v1879_v13, %v262_v15 }
 0x481   :  { %v259_v18 = vpop.f32.mrf.mxu1 }
 0x482   :  { %v269_v19 = vsel %vm268_vm5, %v267_v17, -inf }
 0x483   :  { %270 = vmax.xlane.f32.xlu1 %v269_v19  ;;  %v1509_v20 = vpop.f32.mrf.mxu1 }
 0x485   :  { %v374_v21 = vpop.f32.mrf.mxu1 }
 0x486   :  { %v380_v22 = vmul.f32 0.25, %v374_v21 }
 0x487   :  { %v1520_v23 = vpop.f32.mrf.mxu1 }
 0x488   :  { %v381_v24 = vadd.f32 %v380_v22, %v1879_v13 }
 0x489   :  { %v377_v25 = vpop.f32.mrf.mxu1 }
 0x48a   :  { %v382_v26 = vsel %vm268_vm5, %v381_v24, -inf  ;;  %v517_v25 = vsub.s32 4, %v1831_v48 }
 0x48b   :  { %383 = vmax.xlane.f32.xlu0 %v382_v26  ;;  %v1521_v27 = vpop.f32.mrf.mxu1 }
 0x48c   :  { %v518_v26 = vrot.slane %v1858_v59, %v517_v25 }
 0x50c   :  { %v271_v28 = vpop.xlane.xlu1 %270 }
 0x50d   :  { %v272_v29 = vsub.f32 %v267_v17, %v271_v28 }
 0x50f   :  { %v273_v30 = vmul.f32 1.442695, %v272_v29 }
 0x511   :  { %1671 = vpow2.f32 %v273_v30 }
 0x514   :  { %v384_v31 = vpop.xlane.xlu0 %383 }
 0x515   :  { %v385_v32 = vsub.f32 %v381_v24, %v384_v31 }
 0x517   :  { %v386_v33 = vmul.f32 1.442695, %v385_v32 }
 0x519   :  { %1673 = vpow2.f32 %v386_v33  ;;  %v1653_v33 = vld [vmem:[%s2116_s3 + $0x18] sm:$0xff]  }
 0x51e   :  { %v1672_v34 = vpop.eup %1671 }
 0x51f   :  { %v275_v35 = vsel %vm268_vm5, %v1672_v34, 0.0 }
 0x520   :  { %276 = vadd.xlane.f32.xlu0 %v275_v35  ;;  %v1655_v35 = vld [vmem:[%s2116_s3 + $0x8] sm:$0xff]  }
 0x526   :  { %v1674_v36 = vpop.eup %1673 }
 0x527   :  { %v388_v37 = vsel %vm268_vm5, %v1674_v36, 0.0 }
 0x528   :  { %389 = vadd.xlane.f32.xlu1 %v388_v37  ;;  %v528_v37 = vsub.s32 2, %v1831_v48 }
 0x536   :  { %281 = vrot.lane.b32.xlu0 %v211_v0, %s1730_s0 }
 0x539   :  { %394 = vrot.lane.b32.xlu1 %v211_v0, %s1731_s29 }
 0x53d   :  { %454 = vrot.lane.b32.xlu1 %v1820_v43, %s1732_s9 }
 0x541   :  { %452 = vrot.lane.b32.xlu1 %v1826_v44, %s1732_s9 }
 0x5a9   :  { %v277_v38 = vpop.xlane.xlu0 %276 }
 0x5aa   :  { %1675 = vrcp.f32 %v277_v38  ;;  %v529_v38 = vrot.slane %v1858_v59, %v528_v37 }
 0x5ad   :  { %v282_v39 = vpop.permute.xlu0 %281 }
 0x5ae   :  { %v288_v40 = vsel %vm286_vm6, %v282_v39, 0 }
 0x5af   :  { %1511 = vmatpush3.bf16.msra.mxu0 %v288_v40 }
 0x5b0   :  { %1522 = vmatprep.subr.bf16.mxu0 %v1724_v4 }
 0x5b1   :  { %v390_v41 = vpop.xlane.xlu1 %389 }
 0x5b2   :  { %1677 = vrcp.f32 %v390_v41 }
 0x5b5   :  { %v395_v46 = vpop.permute.xlu1 %394 }
 0x5b6   :  { %v400_v52 = vsel %vm286_vm6, %v395_v46, 0 }
 0x5b7   :  { %v1676_v42 = vpop.eup %1675 }
 0x5b8   :  { %v279_v45 = vmul.f32 %v1676_v42, %v1672_v34  ;;  %v1654_v34 = vld [vmem:[%s2116_s3 + $0x10] sm:$0xff]  }
 0x5b9   :  { %v455_v60 = vpop.permute.xlu1 %454 }
 0x5ba   :  { %v280_v47 = vpack.c.bf16 %v279_v45, %v279_v45  ;;  %1529 = vmatpush3.bf16.msra.mxu1 %v455_v60 }
 0x5bb   :  { %1530 = vmatprep.subr.bf16.mxu1 %v1724_v4 }
 0x5bc   :  { %1513 = vmatmul.mubr.msk.bf16.vlgmr.msra.gmra.mxu0 %vm268_vm5, %v280_v47 }
 0x5bd   :  { %1523 = vmatpush3.bf16.msra.mxu0 %v400_v52  ;;  %1524 = vmatprep.mubr.msk.bf16.mxu0 %vm1725_vm0, %v1724_v4  ;;  %v453_v61 = vpop.permute.xlu1 %452 }
 0x5be   :  { %1536 = vmatprep.subr.bf16.mxu0 %v1724_v4  ;;  %1531 = vmatpush3.bf16.msra.mxu1 %v453_v61 }
 0x5bf   :  { %v1678_v53 = vpop.eup %1677  ;;  %1544 = vmatprep.subr.bf16.mxu1 %v1724_v4 }
 0x5c0   :  { %v392_v54 = vmul.f32 %v1678_v53, %v1674_v36  ;;  %v1656_v36 = vld [vmem:[%s2116_s3] sm:$0xff]  }
 0x5c2   :  { %v393_v56 = vpack.c.bf16 %v392_v54, %v392_v54 }
 0x5c4   :  { %1525 = vmatmul.mubr.msk.bf16.vlgmr.msra.gmra.mxu0 %vm268_vm5, %v393_v56 }
 0x5c5   :  { %1537 = vmatpush3.bf16.msra.mxu0 %v1649_v55  ;;  %1540 = vmatprep.mubr.msk.bf16.mxu0 %vm1725_vm0, %v1724_v4 }
 0x5c6   :  { %1538 = vmatprep.subr.bf16.mxu0 %v1724_v4 }
 0x5c9   :  { %1539 = vmatpush3.bf16.msra.mxu0 %v1652_v58 }
 0x5ca   :  { %1556 = vmatprep.subr.bf16.mxu0 %v1724_v4 }
 0x67c   :  { %v324_v62 = vpop.f32.mrf.mxu0 }
 0x67e   :  { %v1514_v63 = vpop.f32.mrf.mxu0 }
 0x680   :  { %v327_v0 = vpop.f32.mrf.mxu0 }
 0x682   :  { %v1515_v1 = vpop.f32.mrf.mxu0 }
 0x684   :  { %v436_v2 = vpop.f32.mrf.mxu0 }
 0x685   :  { %443 = vrot.lane.b32.xlu0 %v436_v2, %s1733_s10 }
 0x686   :  { %v1526_v43 = vpop.f32.mrf.mxu0 }
 0x688   :  { %v439_v3 = vpop.f32.mrf.mxu0 }
 0x68a   :  { %v1527_v5 = vpop.f32.mrf.mxu0 }
 0x6f7   :  { %v444_v44 = vpop.permute.xlu0 %443 }
 0x6f8   :  { %v446_v6 = vsel %vm215_vm4, %v324_v62, %v444_v44  ;;  %v601_v62 = vsub.s32 3, %v1831_v48 }
 0x6f9   :  { %v447_v7 = vpack.c.bf16 %v446_v6, %v446_v6 }
 0x6fa   :  { %v602_v63 = vrot.slane %v1858_v59, %v601_v62 }
 0x6fb   :  { %1533 = vmatmul.mubr.msk.bf16.vlgmr.msra.gmra.mxu1 %vm121_vm3, %v447_v7 }
 0x6fc   :  { %1552 = vmatprep.mubr.msk.bf16.mxu1 %vm1725_vm0, %v1724_v4  ;;  %1545 = vmatpush3.bf16.msra.mxu1 %v1653_v33 }
 0x6fd   :  { %1546 = vmatprep.subr.bf16.mxu1 %v1724_v4 }
 0x700   :  { %1547 = vmatpush3.bf16.msra.mxu1 %v1654_v34 }
 0x701   :  { %1548 = vmatprep.subr.bf16.mxu1 %v1724_v4 }
 0x704   :  { %1549 = vmatpush3.bf16.msra.mxu1 %v1655_v35 }
 0x705   :  { %1550 = vmatprep.subr.bf16.mxu1 %v1724_v4 }
 0x708   :  { %1551 = vmatpush3.bf16.msra.mxu1 %v1656_v36 }
 0x709   :  { %1570 = vmatprep.subr.bf16.mxu1 %v1724_v4 }
 0x7bb   :  { %v495_v9 = vpop.f32.mrf.mxu1 }
 0x7bc   :  { %v496_v10 = vadd.f32 %v495_v9, %v451_v8 }
 0x7bd   :  { %v1534_v11 = vpop.f32.mrf.mxu1 }
 0x7be   :  { %v501_v12 = vadd.f32 %v496_v10, %v1848_v57  ;;  %v522_v57 = vsub.s32 5, %v1831_v48  ;;  %v1966_v11 = vld [vmem:[%s2115_s2 + $0x30] ss:$8 sps:$4 sm:$0xff]  }
 0x7bf   :  { %v498_v14 = vpop.f32.mrf.mxu1 }
 0x7c0   :  { %v502_v15 = vsel %vm121_vm3, %v501_v12, 0.0  ;;  %v523_v29 = vrot.slane %v1858_v59, %v522_v57 }
 0x7c1   :  { %503 = vadd.xlane.f32.xlu0 %v502_v15  ;;  %v1535_v16 = vpop.f32.mrf.mxu1 }
 0x84a   :  { %v504_v17 = vpop.xlane.xlu0 %503 }
 0x84b   :  { %v505_v18 = vmul.f32 0.03125, %v504_v17  ;;  %v686_v17 = vsub.s32 6, %v1831_v48 }
 0x84d   :  { %v506_v19 = vsub.f32 %v501_v12, %v505_v18  ;;  %v1972_v12 = vld [vmem:[%s2115_s2 + $0x20] ss:$8 sps:$4 sm:$0xff]   ;;  %v691_v18 = vsub.s32 7, %v1831_v48 }
 0x84f   :  { %v507_v20 = vmul.f32 %v506_v19, %v506_v19 }
 0x851   :  { %v508_v21 = vsel %vm121_vm3, %v507_v20, 0.0 }
 0x852   :  { %509 = vadd.xlane.f32.xlu1 %v508_v21 }
 0x8db   :  { %v510_v22 = vpop.xlane.xlu1 %509 }
 0x8dc   :  { %v511_v23 = vmul.f32 0.03125, %v510_v22  ;;  %v692_v22 = vrot.slane %v1858_v59, %v691_v18 }
 0x8de   :  { %v512_v24 = vadd.f32 1e-12, %v511_v23 }
 0x8e0   :  { %1679 = vrsqrt.f32 %v512_v24 }
 0x8ed   :  { %v1680_v27 = vpop.eup %1679 }
 0x8ee   :  { %v514_v28 = vmul.f32 %v1680_v27, %v506_v19  ;;  %v687_v19 = vrot.slane %v1858_v59, %v686_v17  ;;  %v1995_v27 = vld [vmem:[%s2117_s4 + $0x8] sm:$0xff] }
 0x8f0   :  { %v519_v30 = vmul.f32 %v518_v26, %v514_v28  ;;  %v705_v28 = vrot.slane %v1995_v27, %v1834_v49 }
 0x8f2   :  { %v524_v31 = vadd.f32 %v523_v29, %v519_v30 }
 0x8f4   :  { %v525_v32 = vpack.c.bf16 %v524_v31, %v524_v31 }
 0x8f6   :  { %1541 = vmatmul.mubr.msk.bf16.vlgmr.msra.gmra.mxu0 %vm121_vm3, %v525_v32 }
 0x8f7   :  { %1560 = vmatprep.mubr.msk.bf16.mxu0 %vm1725_vm0, %v1724_v4  ;;  %1557 = vmatpush3.bf16.msra.mxu0 %v1966_v11 }
 0x8f8   :  { %1558 = vmatprep.subr.bf16.mxu0 %v1724_v4 }
 0x8fb   :  { %1559 = vmatpush3.bf16.msra.mxu0 %v1972_v12 }
 0x8fc   :  { %1564 = vmatprep.subr.bf16.mxu0 %v1724_v4 }
 0x9b6   :  { %v575_v39 = vpop.f32.mrf.mxu0 }
 0x9b7   :  { %v576_v40 = vadd.f32 %v575_v39, %v529_v38 }
 0x9b8   :  { %v1542_v41 = vpop.f32.mrf.mxu0 }
 0x9b9   :  { %v581_v42 = vmul.f32 %v576_v40, %v576_v40 }
 0x9ba   :  { %v578_v45 = vpop.f32.mrf.mxu0 }
 0x9bb   :  { %v582_v46 = vmul.f32 %v581_v42, %v576_v40 }
 0x9bc   :  { %v1543_v47 = vpop.f32.mrf.mxu0 }
 0x9bd   :  { %v583_v52 = vmul.f32 0.044715, %v582_v46 }
 0x9bf   :  { %v584_v53 = vadd.f32 %v583_v52, %v576_v40 }
 0x9c1   :  { %v585_v54 = vmul.f32 0.7978846, %v584_v53 }
 0x9c3   :  { %1681 = vtanh.f32 %v585_v54 }
 0x9d0   :  { %v1682_v55 = vpop.eup %1681 }
 0x9d1   :  { %v587_v56 = vadd.f32 1.0, %v1682_v55 }
 0x9d3   :  { %v588_v58 = vmul.f32 0.5, %v587_v56 }
 0x9d5   :  { %v589_v60 = vmul.f32 %v588_v58, %v576_v40 }
 0x9d7   :  { %v590_v61 = vpack.c.bf16 %v589_v60, %v589_v60 }
 0x9d9   :  { %1553 = vmatmul.mubr.msk.bf16.vlgmr.msra.gmra.mxu1 %vm76_vm2, %v590_v61 }
 0x9da   :  { %1572 = vmatprep.mubr.msk.bf16.mxu1 %vm1725_vm0, %v1724_v4 }
 0xa99   :  { %v664_v0 = vpop.f32.mrf.mxu1 }
 0xa9a   :  { %v665_v1 = vadd.f32 %v664_v0, %v602_v63 }
 0xa9b   :  { %v1554_v2 = vpop.f32.mrf.mxu1 }
 0xa9c   :  { %v670_v43 = vadd.f32 %v665_v1, %v524_v31 }
 0xa9d   :  { %v667_v3 = vpop.f32.mrf.mxu1 }
 0xa9e   :  { %v671_v5 = vsel %vm121_vm3, %v670_v43, 0.0 }
 0xa9f   :  { %672 = vadd.xlane.f32.xlu0 %v671_v5  ;;  %v1555_v44 = vpop.f32.mrf.mxu1 }
 0xb28   :  { %v673_v6 = vpop.xlane.xlu0 %672 }
 0xb29   :  { %v674_v7 = vmul.f32 0.03125, %v673_v6 }
 0xb2b   :  { %v675_v8 = vsub.f32 %v670_v43, %v674_v7 }
 0xb2d   :  { %v676_v9 = vmul.f32 %v675_v8, %v675_v8 }
 0xb2f   :  { %v677_v10 = vsel %vm121_vm3, %v676_v9, 0.0 }
 0xb30   :  { %678 = vadd.xlane.f32.xlu0 %v677_v10 }
 0xbb9   :  { %v679_v14 = vpop.xlane.xlu0 %678 }
 0xbba   :  { %v680_v15 = vmul.f32 0.03125, %v679_v14 }
 0xbbc   :  { %v681_v16 = vadd.f32 1e-12, %v680_v15 }
 0xbbe   :  { %1683 = vrsqrt.f32 %v681_v16 }
 0xbcb   :  { %v1684_v20 = vpop.eup %1683 }
 0xbcc   :  { %v683_v21 = vmul.f32 %v1684_v20, %v675_v8 }
 0xbce   :  { %v688_v23 = vmul.f32 %v687_v19, %v683_v21 }
 0xbd0   :  { %v1985_v24 = vadd.f32 %v692_v22, %v688_v23 }
 0xbd2   :  { %v701_v26 = vpack.c.bf16 %v1985_v24, %v1985_v24 }
 0xbd4   :  { %1561 = vmatmul.mubr.msk.bf16.vlgmr.msra.gmra.mxu0 %vm121_vm3, %v701_v26 }
 0xbd5   :  { %1566 = vmatprep.mubr.msk.bf16.mxu0 %vm1725_vm0, %v1724_v4 }
 0xc94   :  { %v755_v59 = vpop.f32.mrf.mxu0 }
 0xc95   :  { %v756_v29 = vadd.f32 %v755_v59, %v705_v28 }
 0xc96   :  { %v1562_v30 = vpop.f32.mrf.mxu0 }
 0xc97   :  { %v761_v31 = vpack.c.bf16 %v756_v29, %v756_v29 }
 0xc98   :  { %v758_v32 = vpop.f32.mrf.mxu0 }
 0xc99   :  { %875 = vrot.lane.b32.xlu0 %v761_v31, %s1727_s24  ;;  %763 = vrot.lane.b32.xlu1 %v761_v31, %s1728_s25 }
 0xc9a   :  { %v1563_v33 = vpop.f32.mrf.mxu0 }
 0xc9d   :  { %873 = vrot.lane.b32.xlu1 %v761_v31, %s1729_s26 }
 0xd0b   :  { %v764_v34 = vpop.permute.xlu1 %763  ;;  %v876_v36 = vpop.permute.xlu0 %875 }
 0xd0c   :  { %v769_v35 = vsel %vm215_vm4, %v764_v34, 0  ;;  %v881_v49 = vsel %vm215_vm4, %v876_v36, 0  ;;  %v994_v36 = vrot.slane %v1995_v27, %v1842_v51  ;;  %v1661_v51 = vld [vmem:[%s2115_s2 + $0x34] ss:$8 sps:$4 sm:$0xff]  }
 0xd0d   :  { %1565 = vmatpush3.bf16.xpose.msra.mxu0 %v769_v35 }
 0xd0e   :  { %1576 = vmatprep.subr.bf16.mxu0 %v1724_v4 }
 0xd0f   :  { %v874_v38 = vpop.permute.xlu1 %873 }
 0xd14   :  { %1567 = vmatmul.mubr.msk.bf16.vlgmr.msra.gmra.mxu0 %vm215_vm4, %v761_v31 }
 0xd15   :  { %1577 = vmatpush3.bf16.xpose.msra.mxu0 %v881_v49  ;;  %1578 = vmatprep.mubr.msk.bf16.mxu0 %vm1725_vm0, %v1724_v4 }
 0xd16   :  { %1588 = vmatprep.subr.bf16.mxu0 %v1724_v4 }
 0xd1c   :  { %1579 = vmatmul.mubr.msk.bf16.vlgmr.msra.gmra.mxu0 %vm215_vm4, %v874_v38 }
 0xd1d   :  { %1592 = vmatprep.mubr.msk.bf16.mxu0 %vm1725_vm0, %v1724_v4 }
 0xdd4   :  { %v805_v39 = vpop.f32.mrf.mxu0 }
 0xdd5   :  { %v811_v40 = vmul.f32 0.25, %v805_v39 }
 0xdd6   :  { %v1568_v41 = vpop.f32.mrf.mxu0 }
 0xdd7   :  { %v812_v42 = vadd.f32 %v811_v40, %v1879_v13 }
 0xdd8   :  { %v808_v45 = vpop.f32.mrf.mxu0 }
 0xdd9   :  { %v813_v46 = vsel %vm268_vm5, %v812_v42, -inf }
 0xdda   :  { %814 = vmax.xlane.f32.xlu1 %v813_v46  ;;  %v1569_v47 = vpop.f32.mrf.mxu0 }
 0xddc   :  { %v917_v52 = vpop.f32.mrf.mxu0 }
 0xddd   :  { %v923_v53 = vmul.f32 0.25, %v917_v52 }
 0xdde   :  { %v1580_v54 = vpop.f32.mrf.mxu0 }
 0xddf   :  { %v924_v55 = vadd.f32 %v923_v53, %v1879_v13 }
 0xde0   :  { %v920_v56 = vpop.f32.mrf.mxu0 }
 0xde1   :  { %v925_v58 = vsel %vm268_vm5, %v924_v55, -inf }
 0xde2   :  { %926 = vmax.xlane.f32.xlu0 %v925_v58  ;;  %v1581_v60 = vpop.f32.mrf.mxu0 }
 0xde3   :  { %v1061_v60 = vrot.slane %v1995_v27, %v517_v25  ;;  %v1664_v25 = vld [vmem:[%s2116_s3 + $0x30] sm:$0xff]  }
 0xe63   :  { %v815_v61 = vpop.xlane.xlu1 %814 }
 0xe64   :  { %v816_v63 = vsub.f32 %v812_v42, %v815_v61 }
 0xe66   :  { %v817_v0 = vmul.f32 1.442695, %v816_v63 }
 0xe68   :  { %1685 = vpow2.f32 %v817_v0  ;;  %v1066_v0 = vrot.slane %v1995_v27, %v522_v57  ;;  %v1665_v57 = vld [vmem:[%s2116_s3 + $0x28] sm:$0xff]  }
 0xe6b   :  { %v927_v1 = vpop.xlane.xlu0 %926 }
 0xe6c   :  { %v928_v2 = vsub.f32 %v924_v55, %v927_v1 }
 0xe6e   :  { %v929_v43 = vmul.f32 1.442695, %v928_v2 }
 0xe70   :  { %1687 = vpow2.f32 %v929_v43 }
 0xe75   :  { %v1686_v3 = vpop.eup %1685 }
 0xe76   :  { %v819_v5 = vsel %vm268_vm5, %v1686_v3, 0.0 }
 0xe77   :  { %820 = vadd.xlane.f32.xlu0 %v819_v5  ;;  %v1666_v5 = vld [vmem:[%s2116_s3 + $0x20] sm:$0xff]  }
 0xe7d   :  { %v1688_v44 = vpop.eup %1687 }
 0xe7e   :  { %v931_v13 = vsel %vm268_vm5, %v1688_v44, 0.0 }
 0xe7f   :  { %932 = vadd.xlane.f32.xlu1 %v931_v13 }
 0xe8d   :  { %825 = vrot.lane.b32.xlu0 %v761_v31, %s1730_s0 }
 0xe90   :  { %937 = vrot.lane.b32.xlu1 %v761_v31, %s1731_s29 }
 0xe94   :  { %997 = vrot.lane.b32.xlu1 %v1966_v11, %s1732_s9 }
 0xe98   :  { %995 = vrot.lane.b32.xlu1 %v1972_v12, %s1732_s9 }
 0xf00   :  { %v821_v6 = vpop.xlane.xlu0 %820 }
 0xf01   :  { %1689 = vrcp.f32 %v821_v6 }
 0xf04   :  { %v826_v7 = vpop.permute.xlu0 %825 }
 0xf05   :  { %v831_v8 = vsel %vm286_vm6, %v826_v7, 0 }
 0xf06   :  { %1571 = vmatpush3.bf16.msra.mxu1 %v831_v8 }
 0xf07   :  { %1582 = vmatprep.subr.bf16.mxu1 %v1724_v4 }
 0xf08   :  { %v933_v9 = vpop.xlane.xlu1 %932 }
 0xf09   :  { %1691 = vrcp.f32 %v933_v9 }
 0xf0c   :  { %v938_v15 = vpop.permute.xlu1 %937 }
 0xf0d   :  { %v943_v19 = vsel %vm286_vm6, %v938_v15, 0 }
 0xf0e   :  { %v1690_v10 = vpop.eup %1689 }
 0xf0f   :  { %v823_v14 = vmul.f32 %v1690_v10, %v1686_v3  ;;  %v1663_v3 = vld [vmem:[%s2116_s3 + $0x38] sm:$0xff]  }
 0xf10   :  { %v998_v21 = vpop.permute.xlu1 %997 }
 0xf11   :  { %v824_v16 = vpack.c.bf16 %v823_v14, %v823_v14  ;;  %1589 = vmatpush3.bf16.msra.mxu0 %v998_v21 }
 0xf12   :  { %1590 = vmatprep.subr.bf16.mxu0 %v1724_v4 }
 0xf13   :  { %1573 = vmatmul.mubr.msk.bf16.vlgmr.msra.gmra.mxu1 %vm268_vm5, %v824_v16 }
 0xf14   :  { %1583 = vmatpush3.bf16.msra.mxu1 %v943_v19  ;;  %1584 = vmatprep.mubr.msk.bf16.mxu1 %vm1725_vm0, %v1724_v4  ;;  %v996_v22 = vpop.permute.xlu1 %995 }
 0xf15   :  { %1596 = vmatprep.subr.bf16.mxu1 %v1724_v4  ;;  %1591 = vmatpush3.bf16.msra.mxu0 %v996_v22 }
 0xf16   :  { %v1692_v11 = vpop.eup %1691  ;;  %1604 = vmatprep.subr.bf16.mxu0 %v1724_v4 }
 0xf17   :  { %v935_v12 = vmul.f32 %v1692_v11, %v1688_v44  ;;  %v1072_v44 = vrot.slane %v1995_v27, %v528_v37  ;;  %v1146_v37 = vrot.slane %v1995_v27, %v601_v62  ;;  %v1667_v62 = vld [vmem:[%s2115_s2 + $0x50] ss:$8 sps:$4 sm:$0xff]  }
 0xf19   :  { %v936_v20 = vpack.c.bf16 %v935_v12, %v935_v12 }
 0xf1b   :  { %1585 = vmatmul.mubr.msk.bf16.vlgmr.msra.gmra.mxu1 %vm268_vm5, %v936_v20 }
 0xf1c   :  { %1600 = vmatprep.mubr.msk.bf16.mxu1 %vm1725_vm0, %v1724_v4  ;;  %1597 = vmatpush3.bf16.msra.mxu1 %v1661_v51 }
 0xf1d   :  { %1598 = vmatprep.subr.bf16.mxu1 %v1724_v4 }
 0xfd3   :  { %v867_v23 = vpop.f32.mrf.mxu1 }
 0xfd5   :  { %v1574_v26 = vpop.f32.mrf.mxu1 }
 0xfd7   :  { %v870_v28 = vpop.f32.mrf.mxu1 }
 0xfd9   :  { %v1575_v59 = vpop.f32.mrf.mxu1 }
 0xfdb   :  { %v979_v29 = vpop.f32.mrf.mxu1 }
 0xfdc   :  { %986 = vrot.lane.b32.xlu0 %v979_v29, %s1733_s10 }
 0xfdd   :  { %v1586_v30 = vpop.f32.mrf.mxu1 }
 0xfdf   :  { %v982_v31 = vpop.f32.mrf.mxu1 }
 0xfe1   :  { %v1587_v32 = vpop.f32.mrf.mxu1 }
0x104e   :  { %v987_v33 = vpop.permute.xlu0 %986 }
0x104f   :  { %v989_v34 = vsel %vm215_vm4, %v867_v23, %v987_v33 }
0x1050   :  { %v990_v35 = vpack.c.bf16 %v989_v34, %v989_v34 }
0x1052   :  { %1593 = vmatmul.mubr.msk.bf16.vlgmr.msra.gmra.mxu0 %vm121_vm3, %v990_v35 }
0x1053   :  { %1612 = vmatprep.mubr.msk.bf16.mxu0 %vm1725_vm0, %v1724_v4  ;;  %1605 = vmatpush3.bf16.msra.mxu0 %v1663_v3 }
0x1054   :  { %1606 = vmatprep.subr.bf16.mxu0 %v1724_v4 }
0x1057   :  { %1607 = vmatpush3.bf16.msra.mxu0 %v1664_v25 }
0x1058   :  { %1608 = vmatprep.subr.bf16.mxu0 %v1724_v4 }
0x105b   :  { %1609 = vmatpush3.bf16.msra.mxu0 %v1665_v57 }
0x105c   :  { %1610 = vmatprep.subr.bf16.mxu0 %v1724_v4 }
0x105f   :  { %1611 = vmatpush3.bf16.msra.mxu0 %v1666_v5 }
0x1112   :  { %v1038_v49 = vpop.f32.mrf.mxu0 }
0x1113   :  { %v1039_v38 = vadd.f32 %v1038_v49, %v994_v36  ;;  %v1668_v49 = vld [vmem:[%s2115_s2 + $0x40] ss:$8 sps:$4 sm:$0xff]  }
0x1114   :  { %v1594_v39 = vpop.f32.mrf.mxu0 }
0x1115   :  { %v1044_v40 = vadd.f32 %v1039_v38, %v1985_v24  ;;  %v1662_v24 = vld [vmem:[%s2115_s2 + $0x24] ss:$8 sps:$4 sm:$0xff]   ;;  %s1734_s2 = smov [#allocation2]  }
0x1116   :  { %v1041_v41 = vpop.f32.mrf.mxu0  ;;  %1599 = vmatpush3.bf16.msra.mxu1 %v1662_v24 }
0x1117   :  { %v1045_v42 = vsel %vm121_vm3, %v1044_v40, 0.0  ;;  %1616 = vmatprep.subr.bf16.mxu1 %v1724_v4  ;;  %v1231_v41 = vrot.slane %v1995_v27, %v686_v17  ;;  %v1257_v17 = vrot.slane %v1839_v50, 2 }
0x1118   :  { %1046 = vadd.xlane.f32.xlu0 %v1045_v42  ;;  %v1595_v45 = vpop.f32.mrf.mxu0 }
0x11a1   :  { %v1047_v46 = vpop.xlane.xlu0 %1046 }
0x11a2   :  { %v1048_v47 = vmul.f32 0.03125, %v1047_v46  ;;  %v1236_v46 = vrot.slane %v1995_v27, %v691_v18 }
0x11a4   :  { %v1049_v52 = vsub.f32 %v1044_v40, %v1048_v47 }
0x11a6   :  { %v1050_v53 = vmul.f32 %v1049_v52, %v1049_v52 }
0x11a8   :  { %v1051_v54 = vsel %vm121_vm3, %v1050_v53, 0.0 }
0x11a9   :  { %1052 = vadd.xlane.f32.xlu1 %v1051_v54 }
0x11ba   :  { %1306 = vrot.lane.b32.xlu1 %v1667_v62, %s1728_s25 }
0x1232   :  { %v1053_v55 = vpop.xlane.xlu1 %1052 }
0x1233   :  { %v1054_v56 = vmul.f32 0.03125, %v1053_v55 }
0x1235   :  { %v1055_v58 = vadd.f32 1e-12, %v1054_v56 }
0x1236   :  { %v1307_v54 = vpop.permute.xlu1 %1306 }
0x1237   :  { %1693 = vrsqrt.f32 %v1055_v58 }
0x1244   :  { %v1694_v61 = vpop.eup %1693 }
0x1245   :  { %v1057_v63 = vmul.f32 %v1694_v61, %v1049_v52 }
0x1247   :  { %v1062_v1 = vmul.f32 %v1061_v60, %v1057_v63  ;;  %v1310_v60 = vrot.slane %v1839_v50, 3 }
0x1249   :  { %v1067_v2 = vadd.f32 %v1066_v0, %v1062_v1 }
0x124b   :  { %v1068_v43 = vpack.c.bf16 %v1067_v2, %v1067_v2 }
0x124d   :  { %1601 = vmatmul.mubr.msk.bf16.vlgmr.msra.gmra.mxu1 %vm121_vm3, %v1068_v43 }
0x124e   :  { %1620 = vmatprep.mubr.msk.bf16.mxu1 %vm1725_vm0, %v1724_v4  ;;  %1617 = vmatpush3.bf16.msra.mxu1 %v1667_v62 }
0x124f   :  { %1618 = vmatprep.subr.bf16.mxu1 %v1724_v4 }
0x1252   :  { %1619 = vmatpush3.bf16.msra.mxu1 %v1668_v49 }
0x1253   :  { %1624 = vmatprep.subr.bf16.mxu1 %v1724_v4 }
0x130d   :  { %v1118_v13 = vpop.f32.mrf.mxu1 }
0x130e   :  { %v1119_v6 = vadd.f32 %v1118_v13, %v1072_v44 }
0x130f   :  { %v1602_v7 = vpop.f32.mrf.mxu1 }
0x1310   :  { %v1124_v8 = vmul.f32 %v1119_v6, %v1119_v6 }
0x1311   :  { %v1121_v9 = vpop.f32.mrf.mxu1 }
0x1312   :  { %v1125_v10 = vmul.f32 %v1124_v8, %v1119_v6 }
0x1313   :  { %v1603_v14 = vpop.f32.mrf.mxu1 }
0x1314   :  { %v1126_v15 = vmul.f32 0.044715, %v1125_v10 }
0x1316   :  { %v1127_v16 = vadd.f32 %v1126_v15, %v1119_v6 }
0x1318   :  { %v1128_v19 = vmul.f32 0.7978846, %v1127_v16 }
0x131a   :  { %1695 = vtanh.f32 %v1128_v19 }
0x1327   :  { %v1696_v11 = vpop.eup %1695 }
0x1328   :  { %v1130_v12 = vadd.f32 1.0, %v1696_v11 }
0x132a   :  { %v1131_v20 = vmul.f32 0.5, %v1130_v12 }
0x132c   :  { %v1132_v21 = vmul.f32 %v1131_v20, %v1119_v6 }
0x132e   :  { %v1133_v22 = vpack.c.bf16 %v1132_v21, %v1132_v21 }
0x1330   :  { %1613 = vmatmul.mubr.msk.bf16.vlgmr.msra.gmra.mxu0 %vm76_vm2, %v1133_v22 }
0x13f0   :  { %v1208_v23 = vpop.f32.mrf.mxu0 }
0x13f1   :  { %v1209_v26 = vadd.f32 %v1208_v23, %v1146_v37 }
0x13f2   :  { %v1614_v28 = vpop.f32.mrf.mxu0 }
0x13f3   :  { %v1214_v59 = vadd.f32 %v1209_v26, %v1067_v2 }
0x13f4   :  { %v1211_v29 = vpop.f32.mrf.mxu0 }
0x13f5   :  { %v1215_v30 = vsel %vm121_vm3, %v1214_v59, 0.0 }
0x13f6   :  { %1216 = vadd.xlane.f32.xlu0 %v1215_v30  ;;  %v1615_v31 = vpop.f32.mrf.mxu0 }
0x147f   :  { %v1217_v32 = vpop.xlane.xlu0 %1216 }
0x1480   :  { %v1218_v33 = vmul.f32 0.03125, %v1217_v32 }
0x1482   :  { %v1219_v34 = vsub.f32 %v1214_v59, %v1218_v33 }
0x1484   :  { %v1220_v35 = vmul.f32 %v1219_v34, %v1219_v34 }
0x1486   :  { %v1221_v36 = vsel %vm121_vm3, %v1220_v35, 0.0 }
0x1487   :  { %1222 = vadd.xlane.f32.xlu0 %v1221_v36 }
0x149d   :  { %1304 = vrot.lane.b32.xlu0 %v1668_v49, %s1728_s25  ;;  %s1363_s25 = sshll.u32 %s1734_s2, 4  ;;  %s1364_s25 = int_to_ptr.vmem [resolvable:$true] %s1363_s25 }
0x149e   :  { %s1701_s13 = scalar_lea.vmem %s1364_s25, 16  ;;  %s1705_s14 = scalar_lea.vmem %s1364_s25, 32 }
0x149f   :  { %p1702_p0 = scmp.ne.s32.totalorder %s1364_s25, %s1701_s13  ;;  %p1706_p1 = scmp.lt.s32.totalorder %s1364_s25, %s1364_s25 }
0x14a0   :  { %p1707_p2 = scmp.lt.s32.totalorder %s1705_s14, %s1701_s13 }
0x14a2   :  { %p1708_p3 = por %p1707_p2, %p1706_p1 }
0x14a4   :  { %p1709_p4 = pnand %p1708_p3, %p1702_p0 }
0x1510   :  { %v1223_v38 = vpop.xlane.xlu0 %1222 }
0x1511   :  { %v1224_v39 = vmul.f32 0.03125, %v1223_v38 }
0x1513   :  { %v1225_v40 = vadd.f32 1e-12, %v1224_v39 }
0x1514   :  { %v1305_v51 = vpop.permute.xlu0 %1304 }
0x1515   :  { %1697 = vrsqrt.f32 %v1225_v40 }
0x1522   :  { %v1698_v42 = vpop.eup %1697 }
0x1523   :  { %v1227_v45 = vmul.f32 %v1698_v42, %v1219_v34 }
0x1525   :  { %v1232_v47 = vmul.f32 %v1231_v41, %v1227_v45 }
0x1527   :  { %v1237_v52 = vadd.f32 %v1236_v46, %v1232_v47 }
0x1529   :  { %v1243_v53 = vpack.c.bf16 %v1237_v52, %v1237_v52 }
0x152b   :  { %1621 = vmatmul.mubr.msk.bf16.vlgmr.msra.gmra.mxu1 %vm121_vm3, %v1243_v53 }
0x152c   :  { %1628 = vmatprep.mubr.msk.bf16.mxu1 %vm1725_vm0, %v1724_v4  ;;  %1625 = vmatpush3.bf16.msra.mxu1 %v1307_v54 }
0x152d   :  { %1626 = vmatprep.subr.bf16.mxu1 %v1724_v4 }
0x1530   :  { %1627 = vmatpush3.bf16.msra.mxu1 %v1305_v51 }
0x15eb   :  { %v1296_v24 = vpop.f32.mrf.mxu1 }
0x15ec   :  { %v1297_v48 = vadd.f32 %v1296_v24, %v1257_v17 }
0x15ed   :  { %v1622_v55 = vpop.f32.mrf.mxu1 }
0x15ee   :  { %1699 = vtanh.f32 %v1297_v48 }
0x15ef   :  { %v1299_v18 = vpop.f32.mrf.mxu1 }
0x15f1   :  { %v1623_v27 = vpop.f32.mrf.mxu1 }
0x15fb   :  { %v1700_v56 = vpop.eup %1699 }
0x15fc   :  { %v1303_v58 = vpack.c.bf16 %v1700_v56, %v1700_v56 }
0x15fe   :  { %1629 = vmatmul.mubr.msk.bf16.vlgmr.msra.gmra.mxu1 %vm121_vm3, %v1303_v58 }
0x16be   :  { %v1349_v61 = vpop.f32.mrf.mxu1 }
0x16bf   :  { %v1350_v4 = vadd.f32 %v1349_v61, %v1310_v60 }
0x16c0   :  { %v1630_v63 = vpop.f32.mrf.mxu1 }
0x16c1   :  { %1356 = vst.msk [vmem:[#allocation2] sm:$0x1] %vm1355_vm7, %v1350_v4 }
0x16c2   :  { %v1352_v0 = vpop.f32.mrf.mxu1 }
0x16c3   :  { %1712 = shalt.err (!%p1709_p4)
}
0x16c4   :  { %1366 = dma.vmem_to_hbm [thread:$0]  %s1364_s25, 16, %s2118_s5, [#allocation3]   ;;  %v1631_v50 = vpop.f32.mrf.mxu1 }
0x16c5   :  { %1721 = dma.done.wait [#allocation3], 16  }
0x16c6   :  { %1722 = vsyncadd [#allocation3], 4294967280 }
0x16c7   :  { %1370 = vsyncpa [#allocation3], 1 }

</bundles_post_ra>
